<compile_context>
chip_gen: v5e
topology: v5e:2x2
jax: 0.10.0
libtpu: 0.0.40
codegen_flags: <defaults>
</compile_context>

<pallas_src>
import jax
import jax.numpy as jnp
from jax.experimental import pallas as pl
from jax.experimental.pallas import tpu as pltpu


def _round_up(n, m):
    return ((n + m - 1) // m) * m


def _vae_kernel(
    x_ref,                     # [TB, input_dim] f32
    w1_ref, b1_ref,            # img_2_hidden      (w bf16, b f32)
    wh_ref, bh_ref,            # fused heads       (w bf16, b f32)  [hidden, P]
    w2_ref, b2_ref,            # z_2_hidden stacked (w bf16, b f32) [P, hidden]
    w3_ref, b3_ref,            # hidden_2_image    (w bf16, b f32)
    eps_ref,                   # [TB, P] f32 gate: [1..1 | eps | 0..0]
    xrec_ref,                  # [TB, input_dim] f32
    musig_ref,                 # [TB, P] f32  (cols [0:z)=mu, [z:2z)=sigma)
):
    bf16 = jnp.bfloat16
    x = x_ref[...]

    # ---- Encoder ----
    h = jnp.dot(x.astype(bf16), w1_ref[...],
                preferred_element_type=jnp.float32) + b1_ref[...]
    h = jnp.maximum(h, 0.0)  # ReLU (f32 on VPU)

    # Fused heads.  Column layout preserves the reference module's swap:
    #   cols [0:z)   -> mu    (from hidden_2_sigma)
    #   cols [z:2z)  -> sigma (from hidden_2_mu)
    #   cols [2z:P)  -> zero padding (lane-dense output)
    head = jnp.dot(h.astype(bf16), wh_ref[...],
                   preferred_element_type=jnp.float32) + bh_ref[...]

    # ---- Reparametrization trick (no lane slicing) ----
    # gate = [1..1 | eps | 0..0]  =>  gated = [mu | sigma*eps | 0]
    # w2 is stacked [w2; w2; 0]   =>  gated @ w2s == (mu + sigma*eps) @ w2
    gated = head * eps_ref[...]

    # ---- Decoder ----
    h2 = jnp.dot(gated.astype(bf16), w2_ref[...],
                 preferred_element_type=jnp.float32) + b2_ref[...]
    h2 = jnp.maximum(h2, 0.0)  # ReLU
    logits = jnp.dot(h2.astype(bf16), w3_ref[...],
                     preferred_element_type=jnp.float32) + b3_ref[...]

    xrec_ref[...] = jax.nn.sigmoid(logits)
    musig_ref[...] = head


def pack_params(params, z_dim):
    """Fuse the two encoder heads (mu from w_sigma -- intentional swap, matches
    the reference), pad the head to 128 lanes, stack the decoder-input weight,
    and cast all MXU weight operands to bfloat16."""
    input_dim, hidden = params["w1"].shape
    P = max(128, _round_up(2 * z_dim, 128))
    bf16 = jnp.bfloat16

    w_head = jnp.zeros((hidden, P), jnp.float32)
    w_head = w_head.at[:, :z_dim].set(params["w_sigma"])          # -> mu
    w_head = w_head.at[:, z_dim:2 * z_dim].set(params["w_mu"])    # -> sigma
    b_head = jnp.zeros((1, P), jnp.float32)
    b_head = b_head.at[:, :z_dim].set(params["b_sigma"])
    b_head = b_head.at[:, z_dim:2 * z_dim].set(params["b_mu"])

    # [mu | sigma*eps | 0] @ [w2; w2; 0] == (mu + sigma*eps) @ w2
    w2s = jnp.zeros((P, hidden), jnp.float32)
    w2s = w2s.at[:z_dim].set(params["w2"])
    w2s = w2s.at[z_dim:2 * z_dim].set(params["w2"])

    return {
        "w1": params["w1"].astype(bf16), "b1": params["b1"],
        "w_head": w_head.astype(bf16), "b_head": b_head,
        "w2s": w2s.astype(bf16), "b2": params["b2"],
        "w3": params["w3"].astype(bf16), "b3": params["b3"],
        "z_dim": z_dim, "P": P, "input_dim": input_dim, "hidden": hidden,
    }


def vae_forward(x, packed, eps, *, tb=256):
    """Run the fused VAE forward kernel.

    x:      [B, input_dim] f32
    eps:    [B, z_dim]     f32 (epsilon ~ N(0,1), generated outside the kernel)
    packed: output of pack_params()
    returns (x_reconstructed [B, input_dim], mu [B, z_dim], sigma [B, z_dim])
    """
    B, input_dim = x.shape
    z = packed["z_dim"]
    P = packed["P"]

    # Batch tile: multiple of 8 (f32 sublanes), as large as requested but no
    # larger than the padded batch.
    tb = max(8, min(_round_up(tb, 8), _round_up(B, 8)))
    B_pad = _round_up(B, tb)
    num_tiles = B_pad // tb

    if B_pad != B:
        x = jnp.pad(x, ((0, B_pad - B), (0, 0)))
        eps = jnp.pad(eps, ((0, B_pad - B), (0, 0)))

    # eps gate: [ones | eps | zeros]  (built once in the wrapper)
    eps_gate = jnp.zeros((B_pad, P), jnp.float32)
    eps_gate = eps_gate.at[:, :z].set(1.0)
    eps_gate = eps_gate.at[:, z:2 * z].set(eps)

    def batch_spec(cols):
        return pl.BlockSpec((tb, cols), lambda i: (i, 0))

    def const_spec(arr):
        # Same block every grid step -> weight stays VMEM-resident (no re-DMA).
        return pl.BlockSpec(arr.shape, lambda i: (0, 0))

    xrec, musig = pl.pallas_call(
        _vae_kernel,
        grid=(num_tiles,),
        in_specs=[
            batch_spec(input_dim),
            const_spec(packed["w1"]), const_spec(packed["b1"]),
            const_spec(packed["w_head"]), const_spec(packed["b_head"]),
            const_spec(packed["w2s"]), const_spec(packed["b2"]),
            const_spec(packed["w3"]), const_spec(packed["b3"]),
            batch_spec(P),
        ],
        out_specs=(
            pl.BlockSpec((tb, input_dim), lambda i: (i, 0)),
            pl.BlockSpec((tb, P), lambda i: (i, 0)),
        ),
        out_shape=(
            jax.ShapeDtypeStruct((B_pad, input_dim), jnp.float32),
            jax.ShapeDtypeStruct((B_pad, P), jnp.float32),
        ),
        compiler_params=pltpu.CompilerParams(
            dimension_semantics=("parallel",),   # batch tiles -> both TCs on v7x
        ),
    )(x, packed["w1"], packed["b1"], packed["w_head"], packed["b_head"],
      packed["w2s"], packed["b2"], packed["w3"], packed["b3"], eps_gate)

    x_rec = xrec[:B]
    mu = musig[:B, :z]
    sigma = musig[:B, z:2 * z]
    return x_rec, mu, sigma


def init_params(key, input_dim, hidden_dim, z_dim):
    """Deterministic synthetic parameter init (weights in [in, out] layout)."""
    ks = jax.random.split(key, 10)

    def lin(kw, kb, fan_in, fan_out):
        bound = 1.0 / jnp.sqrt(fan_in)
        w = jax.random.uniform(kw, (fan_in, fan_out), jnp.float32, -bound, bound)
        b = jax.random.uniform(kb, (1, fan_out), jnp.float32, -bound, bound)
        return w, b

    w1, b1 = lin(ks[0], ks[1], input_dim, hidden_dim)
    w_mu, b_mu = lin(ks[2], ks[3], hidden_dim, z_dim)
    w_sigma, b_sigma = lin(ks[4], ks[5], hidden_dim, z_dim)
    w2, b2 = lin(ks[6], ks[7], z_dim, hidden_dim)
    w3, b3 = lin(ks[8], ks[9], hidden_dim, input_dim)
    return {
        "w1": w1, "b1": b1,
        "w_mu": w_mu, "b_mu": b_mu,
        "w_sigma": w_sigma, "b_sigma": b_sigma,
        "w2": w2, "b2": b2,
        "w3": w3, "b3": b3,
    }


def vae_ref(x, params, eps):
    """Pure-JAX f32 reference (exact module semantics, including the head swap)."""
    h = jnp.maximum(x @ params["w1"] + params["b1"], 0.0)
    mu = h @ params["w_sigma"] + params["b_sigma"]      # swapped, as in torch code
    sigma = h @ params["w_mu"] + params["b_mu"]
    z = mu + sigma * eps
    h2 = jnp.maximum(z @ params["w2"] + params["b2"], 0.0)
    x_rec = jax.nn.sigmoid(h2 @ params["w3"] + params["b3"])
    return x_rec, mu, sigma


if __name__ == "__main__":
    # Small shapes consistent with the module (flattened 28x28 images,
    # module-default hidden/z dims).
    batch = 32
    input_dim = 784
    hidden_dim = 200
    z_dim = 20

    key = jax.random.PRNGKey(0)
    k_x, k_eps, k_params = jax.random.split(key, 3)

    x = jax.random.uniform(k_x, (batch, input_dim), jnp.float32)   # image in [0,1)
    eps = jax.random.normal(k_eps, (batch, z_dim), jnp.float32)    # randn_like(sigma)
    params = init_params(k_params, input_dim, hidden_dim, z_dim)
    packed = pack_params(params, z_dim)

    # tb=8 -> 4 grid steps, exercises the batch pipeline with resident weights.
    x_rec, mu, sigma = vae_forward(x, packed, eps, tb=8)
    jax.block_until_ready((x_rec, mu, sigma))

    # Verify against pure-f32 reference.  Kernel uses bf16 MXU operands with f32
    # accumulation, so tolerance reflects bf16 rounding (errors are ~1e-3 here).
    xr_ref, mu_ref, sig_ref = vae_ref(x, params, eps)
    assert x_rec.shape == (batch, input_dim)
    assert mu.shape == (batch, z_dim) and sigma.shape == (batch, z_dim)
    assert jnp.allclose(x_rec, xr_ref, atol=2e-2, rtol=2e-2)
    assert jnp.allclose(mu, mu_ref, atol=2e-2, rtol=2e-2)
    assert jnp.allclose(sigma, sig_ref, atol=2e-2, rtol=2e-2)

    print("KERNEL_OK")
</pallas_src>

<mosaic_0001>
module attributes {stable_mosaic.version = 11 : i64} {
  func.func @_vae_kernel(%arg0: i32, %arg1: memref<8x784xf32, #tpu.memory_space<vmem>>, %arg2: memref<784x200xbf16, #tpu.memory_space<vmem>>, %arg3: memref<1x200xf32, #tpu.memory_space<vmem>>, %arg4: memref<200x128xbf16, #tpu.memory_space<vmem>>, %arg5: memref<1x128xf32, #tpu.memory_space<vmem>>, %arg6: memref<128x200xbf16, #tpu.memory_space<vmem>>, %arg7: memref<1x200xf32, #tpu.memory_space<vmem>>, %arg8: memref<200x784xbf16, #tpu.memory_space<vmem>>, %arg9: memref<1x784xf32, #tpu.memory_space<vmem>>, %arg10: memref<8x128xf32, #tpu.memory_space<vmem>>, %arg11: memref<8x784xf32, #tpu.memory_space<vmem>>, %arg12: memref<8x128xf32, #tpu.memory_space<vmem>>) attributes {dimension_semantics = [#tpu.dimension_semantics<parallel>], iteration_bounds = array<i64: 4>, scalar_prefetch = 0 : i64, scratch_operands = 0 : i64, tpu.core_type = #tpu.core_type<tc>, window_params = [{transform_indices = @transform_0, window_bounds = array<i64: 8, 784>}, {pipeline_mode = #tpu.pipeline_mode<synchronous>, transform_indices = @transform_1, window_bounds = array<i64: 784, 200>}, {pipeline_mode = #tpu.pipeline_mode<synchronous>, transform_indices = @transform_2, window_bounds = array<i64: 1, 200>}, {pipeline_mode = #tpu.pipeline_mode<synchronous>, transform_indices = @transform_3, window_bounds = array<i64: 200, 128>}, {pipeline_mode = #tpu.pipeline_mode<synchronous>, transform_indices = @transform_4, window_bounds = array<i64: 1, 128>}, {pipeline_mode = #tpu.pipeline_mode<synchronous>, transform_indices = @transform_5, window_bounds = array<i64: 128, 200>}, {pipeline_mode = #tpu.pipeline_mode<synchronous>, transform_indices = @transform_6, window_bounds = array<i64: 1, 200>}, {pipeline_mode = #tpu.pipeline_mode<synchronous>, transform_indices = @transform_7, window_bounds = array<i64: 200, 784>}, {pipeline_mode = #tpu.pipeline_mode<synchronous>, transform_indices = @transform_8, window_bounds = array<i64: 1, 784>}, {transform_indices = @transform_9, window_bounds = array<i64: 8, 128>}, {transform_indices = @transform_10, window_bounds = array<i64: 8, 784>}, {transform_indices = @transform_11, window_bounds = array<i64: 8, 128>}]} {
    %c0 = arith.constant 0 : index
    %c0_0 = arith.constant 0 : index
    %0 = vector.load %arg1[%c0, %c0_0] : memref<8x784xf32, #tpu.memory_space<vmem>>, vector<8x784xf32>
    %1 = arith.truncf %0 : vector<8x784xf32> to vector<8x784xbf16>
    %c0_1 = arith.constant 0 : index
    %c0_2 = arith.constant 0 : index
    %2 = vector.load %arg2[%c0_1, %c0_2] : memref<784x200xbf16, #tpu.memory_space<vmem>>, vector<784x200xbf16>
    %cst = arith.constant dense<0.000000e+00> : vector<8x200xf32>
    %3 = tpu.matmul %1, %2, %cst {dimension_numbers = #tpu.dot_dimension_numbers<[1], [0], [0], [1], [0, 0, 1, 1], [], []>} : vector<8x784xbf16>, vector<784x200xbf16>, vector<8x200xf32> -> vector<8x200xf32>
    %c0_3 = arith.constant 0 : index
    %c0_4 = arith.constant 0 : index
    %4 = vector.load %arg3[%c0_3, %c0_4] : memref<1x200xf32, #tpu.memory_space<vmem>>, vector<1x200xf32>
    %5 = vector.broadcast %4 : vector<1x200xf32> to vector<8x200xf32>
    %6 = arith.addf %3, %5 : vector<8x200xf32>
    %cst_5 = arith.constant 0.000000e+00 : f32
    %7 = vector.broadcast %cst_5 : f32 to vector<8x200xf32>
    %8 = arith.maximumf %6, %7 : vector<8x200xf32>
    %9 = arith.truncf %8 : vector<8x200xf32> to vector<8x200xbf16>
    %c0_6 = arith.constant 0 : index
    %c0_7 = arith.constant 0 : index
    %10 = vector.load %arg4[%c0_6, %c0_7] : memref<200x128xbf16, #tpu.memory_space<vmem>>, vector<200x128xbf16>
    %cst_8 = arith.constant dense<0.000000e+00> : vector<8x128xf32>
    %11 = tpu.matmul %9, %10, %cst_8 {dimension_numbers = #tpu.dot_dimension_numbers<[1], [0], [0], [1], [0, 0, 1, 1], [], []>} : vector<8x200xbf16>, vector<200x128xbf16>, vector<8x128xf32> -> vector<8x128xf32>
    %c0_9 = arith.constant 0 : index
    %c0_10 = arith.constant 0 : index
    %12 = vector.load %arg5[%c0_9, %c0_10] : memref<1x128xf32, #tpu.memory_space<vmem>>, vector<1x128xf32>
    %13 = vector.broadcast %12 : vector<1x128xf32> to vector<8x128xf32>
    %14 = arith.addf %11, %13 : vector<8x128xf32>
    %c0_11 = arith.constant 0 : index
    %c0_12 = arith.constant 0 : index
    %15 = vector.load %arg10[%c0_11, %c0_12] : memref<8x128xf32, #tpu.memory_space<vmem>>, vector<8x128xf32>
    %16 = arith.mulf %14, %15 : vector<8x128xf32>
    %17 = arith.truncf %16 : vector<8x128xf32> to vector<8x128xbf16>
    %c0_13 = arith.constant 0 : index
    %c0_14 = arith.constant 0 : index
    %18 = vector.load %arg6[%c0_13, %c0_14] : memref<128x200xbf16, #tpu.memory_space<vmem>>, vector<128x200xbf16>
    %cst_15 = arith.constant dense<0.000000e+00> : vector<8x200xf32>
    %19 = tpu.matmul %17, %18, %cst_15 {dimension_numbers = #tpu.dot_dimension_numbers<[1], [0], [0], [1], [0, 0, 1, 1], [], []>} : vector<8x128xbf16>, vector<128x200xbf16>, vector<8x200xf32> -> vector<8x200xf32>
    %c0_16 = arith.constant 0 : index
    %c0_17 = arith.constant 0 : index
    %20 = vector.load %arg7[%c0_16, %c0_17] : memref<1x200xf32, #tpu.memory_space<vmem>>, vector<1x200xf32>
    %21 = vector.broadcast %20 : vector<1x200xf32> to vector<8x200xf32>
    %22 = arith.addf %19, %21 : vector<8x200xf32>
    %cst_18 = arith.constant 0.000000e+00 : f32
    %23 = vector.broadcast %cst_18 : f32 to vector<8x200xf32>
    %24 = arith.maximumf %22, %23 : vector<8x200xf32>
    %25 = arith.truncf %24 : vector<8x200xf32> to vector<8x200xbf16>
    %c0_19 = arith.constant 0 : index
    %c0_20 = arith.constant 0 : index
    %26 = vector.load %arg8[%c0_19, %c0_20] : memref<200x784xbf16, #tpu.memory_space<vmem>>, vector<200x784xbf16>
    %cst_21 = arith.constant dense<0.000000e+00> : vector<8x784xf32>
    %27 = tpu.matmul %25, %26, %cst_21 {dimension_numbers = #tpu.dot_dimension_numbers<[1], [0], [0], [1], [0, 0, 1, 1], [], []>} : vector<8x200xbf16>, vector<200x784xbf16>, vector<8x784xf32> -> vector<8x784xf32>
    %c0_22 = arith.constant 0 : index
    %c0_23 = arith.constant 0 : index
    %28 = vector.load %arg9[%c0_22, %c0_23] : memref<1x784xf32, #tpu.memory_space<vmem>>, vector<1x784xf32>
    %29 = vector.broadcast %28 : vector<1x784xf32> to vector<8x784xf32>
    %30 = arith.addf %27, %29 : vector<8x784xf32>
    %31 = arith.negf %30 : vector<8x784xf32>
    %32 = math.exp %31 : vector<8x784xf32>
    %cst_24 = arith.constant 1.000000e+00 : f32
    %33 = vector.broadcast %cst_24 : f32 to vector<8x784xf32>
    %34 = arith.addf %33, %32 : vector<8x784xf32>
    %35 = arith.divf %33, %34 : vector<8x784xf32>
    %c0_25 = arith.constant 0 : index
    %c0_26 = arith.constant 0 : index
    %36 = vector.load %arg11[%c0_25, %c0_26] : memref<8x784xf32, #tpu.memory_space<vmem>>, vector<8x784xf32>
    tpu.vector_store %arg11[%c0_25, %c0_26], %35 {strides = array<i32>} : memref<8x784xf32, #tpu.memory_space<vmem>>, vector<8x784xf32>,
    %c0_27 = arith.constant 0 : index
    %c0_28 = arith.constant 0 : index
    %37 = vector.load %arg12[%c0_27, %c0_28] : memref<8x128xf32, #tpu.memory_space<vmem>>, vector<8x128xf32>
    tpu.vector_store %arg12[%c0_27, %c0_28], %14 {strides = array<i32>} : memref<8x128xf32, #tpu.memory_space<vmem>>, vector<8x128xf32>,
    return
  }
  func.func @transform_0(%arg0: i32) -> (i32, i32) {
    %c0_i32 = arith.constant 0 : i32
    %c0_i32_0 = arith.constant 0 : i32
    return %arg0, %c0_i32 : i32, i32
  }
  func.func @transform_1(%arg0: i32) -> (i32, i32) {
    %c0_i32 = arith.constant 0 : i32
    %c0_i32_0 = arith.constant 0 : i32
    %c0_i32_1 = arith.constant 0 : i32
    return %c0_i32, %c0_i32_0 : i32, i32
  }
  func.func @transform_2(%arg0: i32) -> (i32, i32) {
    %c0_i32 = arith.constant 0 : i32
    %c0_i32_0 = arith.constant 0 : i32
    %c0_i32_1 = arith.constant 0 : i32
    return %c0_i32, %c0_i32_0 : i32, i32
  }
  func.func @transform_3(%arg0: i32) -> (i32, i32) {
    %c0_i32 = arith.constant 0 : i32
    %c0_i32_0 = arith.constant 0 : i32
    %c0_i32_1 = arith.constant 0 : i32
    return %c0_i32, %c0_i32_0 : i32, i32
  }
  func.func @transform_4(%arg0: i32) -> (i32, i32) {
    %c0_i32 = arith.constant 0 : i32
    %c0_i32_0 = arith.constant 0 : i32
    %c0_i32_1 = arith.constant 0 : i32
    return %c0_i32, %c0_i32_0 : i32, i32
  }
  func.func @transform_5(%arg0: i32) -> (i32, i32) {
    %c0_i32 = arith.constant 0 : i32
    %c0_i32_0 = arith.constant 0 : i32
    %c0_i32_1 = arith.constant 0 : i32
    return %c0_i32, %c0_i32_0 : i32, i32
  }
  func.func @transform_6(%arg0: i32) -> (i32, i32) {
    %c0_i32 = arith.constant 0 : i32
    %c0_i32_0 = arith.constant 0 : i32
    %c0_i32_1 = arith.constant 0 : i32
    return %c0_i32, %c0_i32_0 : i32, i32
  }
  func.func @transform_7(%arg0: i32) -> (i32, i32) {
    %c0_i32 = arith.constant 0 : i32
    %c0_i32_0 = arith.constant 0 : i32
    %c0_i32_1 = arith.constant 0 : i32
    return %c0_i32, %c0_i32_0 : i32, i32
  }
  func.func @transform_8(%arg0: i32) -> (i32, i32) {
    %c0_i32 = arith.constant 0 : i32
    %c0_i32_0 = arith.constant 0 : i32
    %c0_i32_1 = arith.constant 0 : i32
    return %c0_i32, %c0_i32_0 : i32, i32
  }
  func.func @transform_9(%arg0: i32) -> (i32, i32) {
    %c0_i32 = arith.constant 0 : i32
    %c0_i32_0 = arith.constant 0 : i32
    return %arg0, %c0_i32 : i32, i32
  }
  func.func @transform_10(%arg0: i32) -> (i32, i32) {
    %c0_i32 = arith.constant 0 : i32
    %c0_i32_0 = arith.constant 0 : i32
    return %arg0, %c0_i32 : i32, i32
  }
  func.func @transform_11(%arg0: i32) -> (i32, i32) {
    %c0_i32 = arith.constant 0 : i32
    %c0_i32_0 = arith.constant 0 : i32
    return %arg0, %c0_i32 : i32, i32
  }
}

</mosaic_0001>

<bundles_post_ra>
// kernel: tpu_custom_call.1
= control target key start
LH: loop header
LB: loop body
LE: loop exit
PB: predicated region body
PF: predicated region fallthrough
CT: control target
= control target key end

     0   :  { %s5323_s0 = inlined_call_operand.vmem [shape: f32[32,784], index: 0, kind: input, shape index: {}]   ;;  %s5324_s1 = inlined_call_operand.vmem [shape: bf16[784,200], index: 1, kind: input, shape index: {}]   ;;  %s5325_s2 = inlined_call_operand.vmem [shape: f32[1,200], index: 2, kind: input, shape index: {}]   ;;  %s5326_s3 = inlined_call_operand.vmem [shape: bf16[200,128], index: 3, kind: input, shape index: {}]   ;;  %s5327_s4 = inlined_call_operand.vmem [shape: f32[1,128], index: 4, kind: input, shape index: {}]   ;;  %s5328_s5 = inlined_call_operand.vmem [shape: bf16[128,200], index: 5, kind: input, shape index: {}]   ;;  %s5329_s6 = inlined_call_operand.vmem [shape: f32[1,200], index: 6, kind: input, shape index: {}]   ;;  %s5330_s7 = inlined_call_operand.vmem [shape: bf16[200,784], index: 7, kind: input, shape index: {}]   ;;  %s5331_s8 = inlined_call_operand.vmem [shape: f32[1,784], index: 8, kind: input, shape index: {}]   ;;  %s5332_s9 = inlined_call_operand.vmem [shape: f32[32,128], index: 9, kind: input, shape index: {}]   ;;  %s5333_s10 = inlined_call_operand.hbm [shape: f32[32,784], index: 10, kind: output, shape index: {0}]   ;;  %s5334_s11 = inlined_call_operand.hbm [shape: f32[32,128], index: 11, kind: output, shape index: {1}]  }
   0x1   :  { %5338 = sst [smem:[#allocation11_spill]] %s5323_s0 }
   0x2   :  { %5339 = sst [smem:[#allocation12_spill]] %s5324_s1 }
   0x3   :  { %5340 = sst [smem:[#allocation13_spill]] %s5325_s2 }
   0x4   :  { %17 = vsyncpa [#allocation3], 0 }
   0x5   :  { %19 = vsyncpa [#allocation3 + $0x1], 0 }
   0x6   :  { %20 = vsyncpa [#allocation5], 0 }
   0x7   :  { %22 = vsyncpa [#allocation5 + $0x1], 0  ;;  %s3849_s17 = smov 0   ;;  %s3851_s18 = smov 0  }
   0x8   :  { %s3853_s19 = smov 0   ;;  %s3855_s20 = smov 0  }
   0x9 LB: > { %5341 = sst [smem:[#allocation8_spill]] %s3783_s19  ;;  %s3870_s21 = sadd.s32 4294967295, %s3787_s20   ;;  %s3787_s20 = sphi %s3855_s20, %s5350_s20   ;;  %s3783_s19 = sphi %s3853_s19, %s5352_s19   ;;  %s3779_s18 = sphi %s3851_s18, %s5354_s18   ;;  %s3775_s17 = sphi %s3849_s17, %s5353_s17  }
   0xa   : > { %s2538_s22 = sadd.s32 4294967294, %s3787_s20   ;;  %s3874_s23 = sadd.s32 1, %s3787_s20  }
   0xb   : > { %5342 = sst [smem:[#allocation9_spill]] %s3874_s23  ;;  %s255_s24 = sadd.s32 1, %s3783_s19 }
   0xc   : > { %s252_s25 = ssub.s32 %s3787_s20, %s3874_s23  ;;  %p265_p0 = scmp.ne.s32.totalorder %s3783_s19, %s3779_s18 }
   0xd   : > { %p253_p1 = scmp.eq.s32.totalorder %s252_s25, 0  ;;  %p266_p2 = scmp.eq.s32.totalorder %s3870_s21, 3 }
   0xe   : > { %p271_p3 = scmp.ne.s32.totalorder %s3779_s18, %s3775_s17  ;;  %p272_p4 = scmp.eq.s32.totalorder %s2538_s22, 3 }
   0xf   : > { %s3885_s26 = scalar_select %p253_p1, %s3783_s19, %s255_s24  }
  0x10   : > { %p3887_p5 = por %p266_p2, %p265_p0  ;;  %p3891_p6 = por %p272_p4, %p271_p3 }
  0x11   : > { %5343 = sst [smem:[#allocation10_spill]] %s3885_s26  ;;  %p2541_p7 = scmp.ge.s32.totalorder %s3787_s20, 1 }
  0x12   : > { %p355_p8 = scmp.lt.s32.totalorder %s3787_s20, 5 }
  0x14   : > { %p356_p9 = pnand %p2541_p7, %p355_p8 }
  0x15   : > { %s5346_s1 = sld [smem:[#allocation12_spill]] (!%p356_p9)  ;;  %p404_p10 = scmp.lt.s32.totalorder (!%p356_p9), %s3870_s21, 3 }
  0x16   : > { %359 = sbr.rel (%p356_p9) target bundleno = 763 (0x2fb), region = 60  ;;  %s5347_s0 = sld [smem:[#allocation11_spill]] (!%p356_p9) }
  0x17   : > { %s5348_s2 = sld [smem:[#allocation13_spill]] (!%p356_p9)  ;;  %s4770_s29 = sand.u32 (!%p356_p9), 1, %s3779_s18  }
  0x18   : > { %s2542_s25 = sshll.u32 (!%p356_p9), %s4770_s29, 3  ;;  %s3404_s23 = sshll.u32 (!%p356_p9), %s3870_s21, 3 }
  0x19   : > { %s2429_s30 = scalar_lea.hbm (!%p356_p9), %s5334_s11, %s3404_s23  ;;  %s3713_s26 = scalar_lea.hbm (!%p356_p9), %s5334_s11, 32 }
  0x1a   : > { %s2433_s14 = sshll.u32 (!%p356_p9), %s2429_s30, 4  ;;  %s2434_s14 = int_to_ptr.hbm [resolvable:$true] %s2433_s14 }
  0x1b   : > { %v2603_v0 = vld [vmem:[%s5346_s1 + $0x70] sm:$0xf]  ;;  %v3422_v1 = vld [vmem:[%s5346_s1 + $0x74] sm:$0xf0]  ;;  %v2595_v11 = vld [vmem:[%s5346_s1 + $0x60] sm:$0xf] }
  0x1c   : > { %v2731_v2 = vld [vmem:[%s5346_s1 + $0x170] sm:$0xf]  ;;  %v2604_v3 = vor.u32 %v3422_v1, %v2603_v0  ;;  %v3454_v4 = vld [vmem:[%s5346_s1 + $0x174] sm:$0xf0]  ;;  %v3420_v13 = vld [vmem:[%s5346_s1 + $0x64] sm:$0xf0] }
  0x1d   : > { %v2795_v5 = vld [vmem:[%s5346_s1 + $0x1f0] sm:$0xf]  ;;  %v3470_v6 = vld [vmem:[%s5346_s1 + $0x1f4] sm:$0xf0]  ;;  %v2732_v7 = vor.u32 %v3454_v4, %v2731_v2  ;;  %v2723_v14 = vld [vmem:[%s5346_s1 + $0x160] sm:$0xf]  ;;  %v2596_v16 = vor.u32 %v3420_v13, %v2595_v11 }
  0x1e   : > { %v2796_v8 = vor.u32 %v3470_v6, %v2795_v5  ;;  %v2667_v9 = vld [vmem:[%s5346_s1 + $0xf0] sm:$0xf]  ;;  %v3438_v10 = vld [vmem:[%s5346_s1 + $0xf4] sm:$0xf0]  ;;  %1026 = vmatpush.bf16.msra.mxu0 %v2604_v3  ;;  %v3452_v15 = vld [vmem:[%s5346_s1 + $0x164] sm:$0xf0] }
  0x1f   : > { %v2668_v12 = vor.u32 %v3438_v10, %v2667_v9  ;;  %1052 = vmatpush.bf16.msra.mxu2 %v2732_v7  ;;  %v2724_v17 = vor.u32 %v3452_v15, %v2723_v14  ;;  %v2787_v18 = vld [vmem:[%s5346_s1 + $0x1e0] sm:$0xf]  ;;  %v3468_v19 = vld [vmem:[%s5346_s1 + $0x1e4] sm:$0xf0]  ;;  %v2587_v23 = vld [vmem:[%s5346_s1 + $0x50] sm:$0xf] }
  0x20   : > { %1065 = vmatpush.bf16.msra.mxu3 %v2796_v8  ;;  %v2659_v20 = vld [vmem:[%s5346_s1 + $0xe0] sm:$0xf]  ;;  %v2788_v21 = vor.u32 %v3468_v19, %v2787_v18  ;;  %v3436_v22 = vld [vmem:[%s5346_s1 + $0xe4] sm:$0xf0]  ;;  %v3418_v24 = vld [vmem:[%s5346_s1 + $0x54] sm:$0xf0] }
  0x21   : > { %1039 = vmatpush.bf16.msra.mxu1 %v2668_v12  ;;  %v2660_v25 = vor.u32 %v3436_v22, %v2659_v20  ;;  %v2715_v26 = vld [vmem:[%s5346_s1 + $0x150] sm:$0xf]  ;;  %v3450_v27 = vld [vmem:[%s5346_s1 + $0x154] sm:$0xf0]  ;;  %v2588_v29 = vor.u32 %v3418_v24, %v2587_v23  ;;  %v2579_v35 = vld [vmem:[%s5346_s1 + $0x40] sm:$0xf] }
  0x22   : > { %v2779_v28 = vld [vmem:[%s5346_s1 + $0x1d0] sm:$0xf]  ;;  %1027 = vmatpush.bf16.msra.mxu0 %v2596_v16  ;;  %v3466_v30 = vld [vmem:[%s5346_s1 + $0x1d4] sm:$0xf0]  ;;  %v2716_v33 = vor.u32 %v3450_v27, %v2715_v26  ;;  %v3416_v36 = vld [vmem:[%s5346_s1 + $0x44] sm:$0xf0] }
  0x23   : > { %v2651_v31 = vld [vmem:[%s5346_s1 + $0xd0] sm:$0xf]  ;;  %v3434_v32 = vld [vmem:[%s5346_s1 + $0xd4] sm:$0xf0]  ;;  %1053 = vmatpush.bf16.msra.mxu2 %v2724_v17  ;;  %v2780_v34 = vor.u32 %v3466_v30, %v2779_v28  ;;  %v2707_v37 = vld [vmem:[%s5346_s1 + $0x140] sm:$0xf]  ;;  %v2580_v44 = vor.u32 %v3416_v36, %v2579_v35 }
  0x24   : > { %1066 = vmatpush.bf16.msra.mxu3 %v2788_v21  ;;  %v2652_v38 = vor.u32 %v3434_v32, %v2651_v31  ;;  %v3448_v39 = vld [vmem:[%s5346_s1 + $0x144] sm:$0xf0]  ;;  %v2771_v40 = vld [vmem:[%s5346_s1 + $0x1c0] sm:$0xf]  ;;  %v2571_v47 = vld [vmem:[%s5346_s1 + $0x30] sm:$0xf] }
  0x25   : > { %1040 = vmatpush.bf16.msra.mxu1 %v2660_v25  ;;  %v3464_v41 = vld [vmem:[%s5346_s1 + $0x1c4] sm:$0xf0]  ;;  %v2643_v42 = vld [vmem:[%s5346_s1 + $0xc0] sm:$0xf]  ;;  %v2708_v45 = vor.u32 %v3448_v39, %v2707_v37  ;;  %v3414_v48 = vld [vmem:[%s5346_s1 + $0x34] sm:$0xf0] }
  0x26   : > { %v3432_v43 = vld [vmem:[%s5346_s1 + $0xc4] sm:$0xf0]  ;;  %1028 = vmatpush.bf16.msra.mxu0 %v2588_v29  ;;  %v2772_v46 = vor.u32 %v3464_v41, %v2771_v40  ;;  %v2699_v49 = vld [vmem:[%s5346_s1 + $0x130] sm:$0xf]  ;;  %v3446_v51 = vld [vmem:[%s5346_s1 + $0x134] sm:$0xf0]  ;;  %v2572_v56 = vor.u32 %v3414_v48, %v2571_v47 }
  0x27   : > { %1054 = vmatpush.bf16.msra.mxu2 %v2716_v33  ;;  %v2644_v50 = vor.u32 %v3432_v43, %v2643_v42  ;;  %v2763_v52 = vld [vmem:[%s5346_s1 + $0x1b0] sm:$0xf]  ;;  %v3462_v53 = vld [vmem:[%s5346_s1 + $0x1b4] sm:$0xf0]  ;;  %v2700_v57 = vor.u32 %v3446_v51, %v2699_v49  ;;  %v2563_v59 = vld [vmem:[%s5346_s1 + $0x20] sm:$0xf] }
  0x28   : > { %1067 = vmatpush.bf16.msra.mxu3 %v2780_v34  ;;  %v2635_v54 = vld [vmem:[%s5346_s1 + $0xb0] sm:$0xf]  ;;  %v3430_v55 = vld [vmem:[%s5346_s1 + $0xb4] sm:$0xf0]  ;;  %v2764_v58 = vor.u32 %v3462_v53, %v2763_v52  ;;  %v3412_v60 = vld [vmem:[%s5346_s1 + $0x24] sm:$0xf0] }
  0x29   : > { %1041 = vmatpush.bf16.msra.mxu1 %v2652_v38  ;;  %v2691_v61 = vld [vmem:[%s5346_s1 + $0x120] sm:$0xf]  ;;  %v2636_v62 = vor.u32 %v3430_v55, %v2635_v54  ;;  %v3444_v63 = vld [vmem:[%s5346_s1 + $0x124] sm:$0xf0]  ;;  %v2564_v4 = vor.u32 %v3412_v60, %v2563_v59  ;;  %v2555_v5 = vld [vmem:[%s5346_s1 + $0x10] sm:$0xf] }
  0x2a   : > { %1029 = vmatpush.bf16.msra.mxu0 %v2580_v44  ;;  %v2755_v0 = vld [vmem:[%s5346_s1 + $0x1a0] sm:$0xf]  ;;  %v3460_v1 = vld [vmem:[%s5346_s1 + $0x1a4] sm:$0xf0]  ;;  %v3410_v6 = vld [vmem:[%s5346_s1 + $0x14] sm:$0xf0]  ;;  %v2692_v7 = vor.u32 %v3444_v63, %v2691_v61 }
  0x2b   : > { %1055 = vmatpush.bf16.msra.mxu2 %v2708_v45  ;;  %v2627_v2 = vld [vmem:[%s5346_s1 + $0xa0] sm:$0xf]  ;;  %v3428_v3 = vld [vmem:[%s5346_s1 + $0xa4] sm:$0xf0]  ;;  %v2756_v8 = vor.u32 %v3460_v1, %v2755_v0  ;;  %v2683_v9 = vld [vmem:[%s5346_s1 + $0x110] sm:$0xf]  ;;  %v2556_v18 = vor.u32 %v3410_v6, %v2555_v5 }
  0x2c   : > { %1068 = vmatpush.bf16.msra.mxu3 %v2772_v46  ;;  %v3442_v10 = vld [vmem:[%s5346_s1 + $0x114] sm:$0xf0]  ;;  %v2747_v11 = vld [vmem:[%s5346_s1 + $0x190] sm:$0xf]  ;;  %v2628_v12 = vor.u32 %v3428_v3, %v2627_v2  ;;  %v2547_v16 = vld [vmem:[%s5346_s1] sm:$0xf] }
  0x2d   : > { %1042 = vmatpush.bf16.msra.mxu1 %v2644_v50  ;;  %v3458_v13 = vld [vmem:[%s5346_s1 + $0x194] sm:$0xf0]  ;;  %v2619_v14 = vld [vmem:[%s5346_s1 + $0x90] sm:$0xf]  ;;  %v3408_v17 = vld [vmem:[%s5346_s1 + $0x4] sm:$0xf0]  ;;  %v2684_v22 = vor.u32 %v3442_v10, %v2683_v9 }
  0x2e   : > { %1030 = vmatpush.bf16.msra.mxu0 %v2572_v56  ;;  %v3426_v15 = vld [vmem:[%s5346_s1 + $0x94] sm:$0xf0]  ;;  %v2675_v19 = vld [vmem:[%s5346_s1 + $0x100] sm:$0xf]  ;;  %v3440_v20 = vld [vmem:[%s5346_s1 + $0x104] sm:$0xf0]  ;;  %v2748_v23 = vor.u32 %v3458_v13, %v2747_v11  ;;  %v2548_v32 = vor.u32 %v3408_v17, %v2547_v16 }
  0x2f   : > { %1056 = vmatpush.bf16.msra.mxu2 %v2700_v57  ;;  %v2739_v21 = vld [vmem:[%s5346_s1 + $0x180] sm:$0xf]  ;;  %v3456_v24 = vld [vmem:[%s5346_s1 + $0x184] sm:$0xf0]  ;;  %v2859_v25 = vld [vmem:[%s5346_s1 + $0x270] sm:$0xf]  ;;  %v2620_v26 = vor.u32 %v3426_v15, %v2619_v14  ;;  %v2676_v36 = vor.u32 %v3440_v20, %v2675_v19 }
  0x30   : > { %1069 = vmatpush.bf16.msra.mxu3 %v2764_v58  ;;  %s4088_s15 = scalar_select %p404_p10, %s3870_s21, 3  ;;  %v3486_v27 = vld [vmem:[%s5346_s1 + $0x274] sm:$0xf0]  ;;  %v3421_v28 = vld [vmem:[%s5346_s1 + $0x74] sm:$0xf]  ;;  %v2740_v37 = vor.u32 %v3456_v24, %v2739_v21  ;;  %vm1022_vm0 = vcmask 130048  }
  0x31   : > { %1043 = vmatpush.bf16.msra.mxu1 %v2636_v62  ;;  %v2605_v29 = vld [vmem:[%s5346_s1 + $0x78] sm:$0xf0]  ;;  %v2611_v30 = vld [vmem:[%s5346_s1 + $0x80] sm:$0xf]  ;;  %v3424_v31 = vld [vmem:[%s5346_s1 + $0x84] sm:$0xf0]  ;;  %v2860_v41 = vor.u32 %v3486_v27, %v2859_v25 }
  0x32   : > { %1031 = vmatpush.bf16.msra.mxu0 %v2564_v4  ;;  %s3618_s19 = smul.u32 56, %s4088_s15  ;;  %v2923_v33 = vld [vmem:[%s5346_s1 + $0x2f0] sm:$0xf]  ;;  %v2931_v34 = vld [vmem:[%s5346_s1 + $0x300] sm:$0xf]  ;;  %v2608_v42 = vor.u32 %v3421_v28, %v2605_v29  ;;  %v2612_v46 = vor.u32 %v3424_v31, %v2611_v30  ;;  %vm1320_vm1 = vcmask 1043456  }
  0x33   : > { %1057 = vmatpush.bf16.msra.mxu2 %v2692_v7  ;;  %v3504_v35 = vld [vmem:[%s5346_s1 + $0x304] sm:$0xf0]  ;;  %v3502_v38 = vld [vmem:[%s5346_s1 + $0x2f4] sm:$0xf0]  ;;  %v3437_v39 = vld [vmem:[%s5346_s1 + $0xf4] sm:$0xf] }
  0x34   : > { %1070 = vmatpush.bf16.msra.mxu3 %v2756_v8  ;;  %s4118_s13 = scalar_lea.vmem %s5347_s0, %s3618_s19  ;;  %v2669_v40 = vld [vmem:[%s5346_s1 + $0xf8] sm:$0xf0]  ;;  %v2851_v44 = vld [vmem:[%s5346_s1 + $0x260] sm:$0xf]  ;;  %v3484_v45 = vld [vmem:[%s5346_s1 + $0x264] sm:$0xf0]  ;;  %v2932_v47 = vor.u32 %v3504_v35, %v2931_v34  ;;  %v2924_v52 = vor.u32 %v3502_v38, %v2923_v33 }
  0x35   : > { %1044 = vmatpush.bf16.msra.mxu1 %v2628_v12  ;;  %v416_v43 = vld [vmem:[%s4118_s13 + $0x10] sm:$0xff]  ;;  %v3419_v48 = vld [vmem:[%s5346_s1 + $0x64] sm:$0xf]  ;;  %v2597_v49 = vld [vmem:[%s5346_s1 + $0x68] sm:$0xf0]  ;;  %v2672_v54 = vor.u32 %v3437_v39, %v2669_v40  ;;  %v2852_v59 = vor.u32 %v3484_v45, %v2851_v44  ;;  %vm1316_vm2 = vcmask 588800  }
  0x36   : > { %1032 = vmatpush.bf16.msra.mxu0 %v2556_v18  ;;  %v414_v50 = vld [vmem:[%s4118_s13] sm:$0xff]  ;;  %v4143_v51 = vpack.c.bf16 %v416_v43, %v416_v43  ;;  %v417_v53 = vld [vmem:[%s4118_s13 + $0x18] sm:$0xff]  ;;  %v3500_v56 = vld [vmem:[%s5346_s1 + $0x2e4] sm:$0xf0]  ;;  %v2600_v60 = vor.u32 %v3419_v48, %v2597_v49  ;;  %s3707_s16 = sshra.s32 %s2434_s14, 4  ;;  %s3708_s16 = int_to_ptr.hbm [resolvable:$true] %s3707_s16 }
  0x37   : > { %1058 = vmatpush.bf16.msra.mxu2 %v2684_v22  ;;  %v2915_v55 = vld [vmem:[%s5346_s1 + $0x2e0] sm:$0xf]  ;;  %v4152_v57 = vpack.c.bf16 %v414_v50, %v414_v50  ;;  %v415_v58 = vld [vmem:[%s4118_s13 + $0x8] sm:$0xff]  ;;  %v3435_v61 = vld [vmem:[%s5346_s1 + $0xe4] sm:$0xf]  ;;  %v4173_v3 = vpack.c.bf16 %v417_v53, %v417_v53  ;;  %p3714_p0 = scmp.lt.s32.totalorder %s3708_s16, %s5334_s11 }
  0x38   : > { %1071 = vmatpush.bf16.msra.mxu3 %v2748_v23  ;;  %v2661_v62 = vld [vmem:[%s5346_s1 + $0xe8] sm:$0xf0]  ;;  %v2843_v63 = vld [vmem:[%s5346_s1 + $0x250] sm:$0xf]  ;;  %v3482_v0 = vld [vmem:[%s5346_s1 + $0x254] sm:$0xf0]  ;;  %v4175_v4 = vpack.c.bf16 %v415_v58, %v415_v58  ;;  %v2916_v5 = vor.u32 %v3500_v56, %v2915_v55 }
  0x39   : > { %1045 = vmatpush.bf16.msra.mxu1 %v2620_v26  ;;  %v3417_v1 = vld [vmem:[%s5346_s1 + $0x54] sm:$0xf]  ;;  %v2589_v2 = vld [vmem:[%s5346_s1 + $0x58] sm:$0xf0]  ;;  %v2664_v6 = vor.u32 %v3435_v61, %v2661_v62  ;;  %v2907_v7 = vld [vmem:[%s5346_s1 + $0x2d0] sm:$0xf]  ;;  %v2844_v9 = vor.u32 %v3482_v0, %v2843_v63 }
  0x3a   : > { %1033 = vmatpush.bf16.msra.mxu0 %v2548_v32  ;;  %v3498_v8 = vld [vmem:[%s5346_s1 + $0x2d4] sm:$0xf0]  ;;  %v2592_v10 = vor.u32 %v3417_v1, %v2589_v2  ;;  %v3433_v11 = vld [vmem:[%s5346_s1 + $0xd4] sm:$0xf]  ;;  %v2653_v12 = vld [vmem:[%s5346_s1 + $0xd8] sm:$0xf0] }
  0x3b   : > { %1059 = vmatpush.bf16.msra.mxu2 %v2676_v36  ;;  %v2835_v13 = vld [vmem:[%s5346_s1 + $0x240] sm:$0xf]  ;;  %v3480_v14 = vld [vmem:[%s5346_s1 + $0x244] sm:$0xf0]  ;;  %v3415_v15 = vld [vmem:[%s5346_s1 + $0x44] sm:$0xf]  ;;  %v2908_v17 = vor.u32 %v3498_v8, %v2907_v7  ;;  %v2656_v18 = vor.u32 %v3433_v11, %v2653_v12 }
  0x3c   : > { %1072 = vmatpush.bf16.msra.mxu3 %v2740_v37  ;;  %v2581_v16 = vld [vmem:[%s5346_s1 + $0x48] sm:$0xf0]  ;;  %v2899_v19 = vld [vmem:[%s5346_s1 + $0x2c0] sm:$0xf]  ;;  %v3496_v20 = vld [vmem:[%s5346_s1 + $0x2c4] sm:$0xf0]  ;;  %v2836_v21 = vor.u32 %v3480_v14, %v2835_v13 }
  0x3d   : > { %1046 = vmatpush.bf16.msra.mxu1 %v2612_v46  ;;  %1034 = vmatmul.bf16.vlgmr.msra.gmra.mxu0 %v4152_v57  ;;  %v2584_v22 = vor.u32 %v3415_v15, %v2581_v16  ;;  %v3431_v23 = vld [vmem:[%s5346_s1 + $0xc4] sm:$0xf]  ;;  %v2645_v24 = vld [vmem:[%s5346_s1 + $0xc8] sm:$0xf0]  ;;  %v2827_v25 = vld [vmem:[%s5346_s1 + $0x230] sm:$0xf]  ;;  %v2900_v29 = vor.u32 %v3496_v20, %v2899_v19 }
  0x3e   : > { %1078 = vmatpush.bf16.msrb.mxu0 %v2860_v41  ;;  %1060 = vmatmul.bf16.vlgmr.msra.gmra.mxu2 %v4143_v51  ;;  %v3478_v26 = vld [vmem:[%s5346_s1 + $0x234] sm:$0xf0]  ;;  %v3413_v27 = vld [vmem:[%s5346_s1 + $0x34] sm:$0xf]  ;;  %v2573_v28 = vld [vmem:[%s5346_s1 + $0x38] sm:$0xf0]  ;;  %v2648_v30 = vor.u32 %v3431_v23, %v2645_v24 }
  0x3f   : > { %1111 = vmatpush.bf16.msrb.mxu2 %v2932_v47  ;;  %1073 = vmatmul.bf16.vlgmr.msra.gmra.mxu3 %v4173_v3  ;;  %v2891_v31 = vld [vmem:[%s5346_s1 + $0x2b0] sm:$0xf]  ;;  %v3494_v32 = vld [vmem:[%s5346_s1 + $0x2b4] sm:$0xf0]  ;;  %v2828_v34 = vor.u32 %v3478_v26, %v2827_v25  ;;  %v2576_v35 = vor.u32 %v3413_v27, %v2573_v28  ;;  %v3429_v36 = vld [vmem:[%s5346_s1 + $0xb4] sm:$0xf] }
  0x40   : > { %1117 = vmatpush.bf16.msrb.mxu3 %v2608_v42  ;;  %1047 = vmatmul.bf16.vlgmr.msra.gmra.mxu1 %v4175_v4  ;;  %v420_v33 = vld [vmem:[%s4118_s13 + $0x30] sm:$0xff]  ;;  %v2637_v37 = vld [vmem:[%s5346_s1 + $0xb8] sm:$0xf0]  ;;  %v2819_v38 = vld [vmem:[%s5346_s1 + $0x220] sm:$0xf]  ;;  %v2892_v42 = vor.u32 %v3494_v32, %v2891_v31 }
  0x41   : > { %1091 = vmatpush.bf16.msrb.mxu1 %v2924_v52  ;;  %v3476_v39 = vld [vmem:[%s5346_s1 + $0x224] sm:$0xf0]  ;;  %v3411_v40 = vld [vmem:[%s5346_s1 + $0x24] sm:$0xf]  ;;  %v2565_v41 = vld [vmem:[%s5346_s1 + $0x28] sm:$0xf0]  ;;  %v4254_v43 = vpack.c.bf16 %v420_v33, %v420_v33  ;;  %v2640_v44 = vor.u32 %v3429_v36, %v2637_v37 }
  0x42   : > { %1079 = vmatpush.bf16.msrb.mxu0 %v2852_v59  ;;  %v2883_v45 = vld [vmem:[%s5346_s1 + $0x2a0] sm:$0xf]  ;;  %v3492_v46 = vld [vmem:[%s5346_s1 + $0x2a4] sm:$0xf0]  ;;  %v2820_v47 = vor.u32 %v3476_v39, %v2819_v38  ;;  %v2568_v48 = vor.u32 %v3411_v40, %v2565_v41  ;;  %v3427_v49 = vld [vmem:[%s5346_s1 + $0xa4] sm:$0xf] }
  0x43   : > { %1130 = vmatpush.bf16.msra.mxu2 %v2672_v54  ;;  %v2629_v50 = vld [vmem:[%s5346_s1 + $0xa8] sm:$0xf0]  ;;  %v2811_v52 = vld [vmem:[%s5346_s1 + $0x210] sm:$0xf]  ;;  %v3474_v53 = vld [vmem:[%s5346_s1 + $0x214] sm:$0xf0]  ;;  %v2884_v56 = vor.u32 %v3492_v46, %v2883_v45 }
  0x44   : > { %1118 = vmatpush.bf16.msrb.mxu3 %v2600_v60  ;;  %v3409_v54 = vld [vmem:[%s5346_s1 + $0x14] sm:$0xf]  ;;  %v2557_v55 = vld [vmem:[%s5346_s1 + $0x18] sm:$0xf0]  ;;  %v2632_v58 = vor.u32 %v3427_v49, %v2629_v50  ;;  %v2875_v59 = vld [vmem:[%s5346_s1 + $0x290] sm:$0xf]  ;;  %v2812_v62 = vor.u32 %v3474_v53, %v2811_v52 }
  0x45   : > { %1092 = vmatpush.bf16.msrb.mxu1 %v2916_v5  ;;  %v3490_v60 = vld [vmem:[%s5346_s1 + $0x294] sm:$0xf0]  ;;  %v3425_v61 = vld [vmem:[%s5346_s1 + $0x94] sm:$0xf]  ;;  %v2560_v63 = vor.u32 %v3409_v54, %v2557_v55  ;;  %v2621_v0 = vld [vmem:[%s5346_s1 + $0x98] sm:$0xf0] }
  0x46   : > { %1080 = vmatpush.bf16.msrb.mxu0 %v2844_v9  ;;  %v2803_v1 = vld [vmem:[%s5346_s1 + $0x200] sm:$0xf]  ;;  %v3472_v2 = vld [vmem:[%s5346_s1 + $0x204] sm:$0xf0]  ;;  %v3407_v5 = vld [vmem:[%s5346_s1 + $0x4] sm:$0xf]  ;;  %v2876_v8 = vor.u32 %v3490_v60, %v2875_v59  ;;  %v2624_v12 = vor.u32 %v3425_v61, %v2621_v0 }
  0x47   : > { %1131 = vmatpush.bf16.msra.mxu2 %v2664_v6  ;;  %v2549_v6 = vld [vmem:[%s5346_s1 + $0x8] sm:$0xf0]  ;;  %v3453_v7 = vld [vmem:[%s5346_s1 + $0x174] sm:$0xf]  ;;  %v2733_v9 = vld [vmem:[%s5346_s1 + $0x178] sm:$0xf0]  ;;  %v2804_v16 = vor.u32 %v3472_v2, %v2803_v1 }
  0x48   : > { %1119 = vmatpush.bf16.msrb.mxu3 %v2592_v10  ;;  %v3485_v10 = vld [vmem:[%s5346_s1 + $0x274] sm:$0xf]  ;;  %v2861_v11 = vld [vmem:[%s5346_s1 + $0x278] sm:$0xf0]  ;;  %v2867_v13 = vld [vmem:[%s5346_s1 + $0x280] sm:$0xf] }
  0x49   : > { %1093 = vmatpush.bf16.msrb.mxu1 %v2908_v17  ;;  %v3488_v14 = vld [vmem:[%s5346_s1 + $0x284] sm:$0xf0]  ;;  %v418_v15 = vld [vmem:[%s4118_s13 + $0x20] sm:$0xff]  ;;  %v2552_v17 = vor.u32 %v3407_v5, %v2549_v6  ;;  %v2613_v19 = vld [vmem:[%s5346_s1 + $0x88] sm:$0xf0] }
  0x4a   : > { %1081 = vmatpush.bf16.msrb.mxu0 %v2836_v21  ;;  %v3469_v20 = vld [vmem:[%s5346_s1 + $0x1f4] sm:$0xf]  ;;  %v2736_v21 = vor.u32 %v3453_v7, %v2733_v9  ;;  %v2797_v23 = vld [vmem:[%s5346_s1 + $0x1f8] sm:$0xf0]  ;;  %v2868_v26 = vor.u32 %v3488_v14, %v2867_v13  ;;  %v419_v27 = vld [vmem:[%s4118_s13 + $0x28] sm:$0xff]  ;;  %s5349_s13 = sshll.u32 %s4088_s15, 3 }
  0x4b   : > { %1132 = vmatpush.bf16.msra.mxu2 %v2656_v18  ;;  %v3423_v18 = vld [vmem:[%s5346_s1 + $0x84] sm:$0xf]  ;;  %v3501_v24 = vld [vmem:[%s5346_s1 + $0x2f4] sm:$0xf]  ;;  %v2925_v25 = vld [vmem:[%s5346_s1 + $0x2f8] sm:$0xf0]  ;;  %v4361_v37 = vpack.c.bf16 %v419_v27, %v419_v27  ;;  %s412_s12 = scalar_lea.vmem %s5332_s9, %s5349_s13 }
  0x4c   : > { %1120 = vmatpush.bf16.msrb.mxu3 %v2584_v22  ;;  %v2864_v22 = vor.u32 %v3485_v10, %v2861_v11  ;;  %v3451_v28 = vld [vmem:[%s5346_s1 + $0x164] sm:$0xf]  ;;  %v2616_v31 = vor.u32 %v3423_v18, %v2613_v19  ;;  %v2853_v33 = vld [vmem:[%s5346_s1 + $0x268] sm:$0xf0]  ;;  %v2717_v45 = vld [vmem:[%s5346_s1 + $0x158] sm:$0xf0] }
  0x4d   : > { %1094 = vmatpush.bf16.msrb.mxu1 %v2900_v29  ;;  %v2725_v29 = vld [vmem:[%s5346_s1 + $0x168] sm:$0xf0]  ;;  %v3483_v32 = vld [vmem:[%s5346_s1 + $0x264] sm:$0xf]  ;;  %v3481_v46 = vld [vmem:[%s5346_s1 + $0x254] sm:$0xf] }
  0x4e   : > { %1082 = vmatpush.bf16.msrb.mxu0 %v2828_v34  ;;  %2937 = vmatmul.msk.bf16.vlgmr.msrb.gmra.mxu2 %vm1022_vm0, %v4254_v43  ;;  %v2800_v34 = vor.u32 %v3469_v20, %v2797_v23  ;;  %v3467_v36 = vld [vmem:[%s5346_s1 + $0x1e4] sm:$0xf]  ;;  %v2728_v38 = vor.u32 %v3451_v28, %v2725_v29  ;;  %v2789_v39 = vld [vmem:[%s5346_s1 + $0x1e8] sm:$0xf0]  ;;  %v3465_v50 = vld [vmem:[%s5346_s1 + $0x1d4] sm:$0xf] }
  0x4f   : > { %1133 = vmatpush.bf16.msra.mxu2 %v2648_v30  ;;  %v4350_v30 = vpack.c.bf16 %v418_v15, %v418_v15  ;;  %v3499_v40 = vld [vmem:[%s5346_s1 + $0x2e4] sm:$0xf]  ;;  %v2917_v41 = vld [vmem:[%s5346_s1 + $0x2e8] sm:$0xf0]  ;;  %v2781_v53 = vld [vmem:[%s5346_s1 + $0x1d8] sm:$0xf0] }
  0x50   : > { %1121 = vmatpush.bf16.msrb.mxu3 %v2576_v35  ;;  %v2928_v35 = vor.u32 %v3501_v24, %v2925_v25  ;;  %v2920_v49 = vor.u32 %v3499_v40, %v2917_v41  ;;  %v3497_v54 = vld [vmem:[%s5346_s1 + $0x2d4] sm:$0xf]  ;;  %v2909_v55 = vld [vmem:[%s5346_s1 + $0x2d8] sm:$0xf0]  ;;  %v2709_v59 = vld [vmem:[%s5346_s1 + $0x148] sm:$0xf0] }
  0x51   : > { %1095 = vmatpush.bf16.msrb.mxu1 %v2892_v42  ;;  %v2856_v42 = vor.u32 %v3483_v32, %v2853_v33  ;;  %v3479_v60 = vld [vmem:[%s5346_s1 + $0x244] sm:$0xf]  ;;  %v2837_v61 = vld [vmem:[%s5346_s1 + $0x248] sm:$0xf0]  ;;  %v3445_v6 = vld [vmem:[%s5346_s1 + $0x134] sm:$0xf] }
  0x52   : > { %1083 = vmatpush.bf16.msrb.mxu0 %v2820_v47  ;;  %v2845_v47 = vld [vmem:[%s5346_s1 + $0x258] sm:$0xf0]  ;;  %v3463_v0 = vld [vmem:[%s5346_s1 + $0x1c4] sm:$0xf]  ;;  %v2773_v1 = vld [vmem:[%s5346_s1 + $0x1c8] sm:$0xf0]  ;;  %v2840_v5 = vor.u32 %v3479_v60, %v2837_v61 }
  0x53   : > { %1134 = vmatpush.bf16.msra.mxu2 %v2640_v44  ;;  %v3449_v44 = vld [vmem:[%s5346_s1 + $0x154] sm:$0xf]  ;;  %v3495_v2 = vld [vmem:[%s5346_s1 + $0x2c4] sm:$0xf]  ;;  %v2701_v7 = vld [vmem:[%s5346_s1 + $0x138] sm:$0xf0]  ;;  %v2776_v10 = vor.u32 %v3463_v0, %v2773_v1 }
  0x54   : > { %1122 = vmatpush.bf16.msrb.mxu3 %v2568_v48  ;;  %v2792_v48 = vor.u32 %v3467_v36, %v2789_v39  ;;  %v2720_v52 = vor.u32 %v3449_v44, %v2717_v45  ;;  %v2829_v9 = vld [vmem:[%s5346_s1 + $0x238] sm:$0xf0]  ;;  %v2704_v13 = vor.u32 %v3445_v6, %v2701_v7  ;;  %v3493_v15 = vld [vmem:[%s5346_s1 + $0x2b4] sm:$0xf]  ;;  %v3443_v18 = vld [vmem:[%s5346_s1 + $0x124] sm:$0xf] }
  0x55   : > { %1096 = vmatpush.bf16.msrb.mxu1 %v2884_v56  ;;  %v2848_v56 = vor.u32 %v3481_v46, %v2845_v47  ;;  %v2765_v14 = vld [vmem:[%s5346_s1 + $0x1b8] sm:$0xf0]  ;;  %v2693_v19 = vld [vmem:[%s5346_s1 + $0x128] sm:$0xf0]  ;;  %v3475_v20 = vld [vmem:[%s5346_s1 + $0x224] sm:$0xf] }
  0x56   : > { %1084 = vmatpush.bf16.msrb.mxu0 %v2812_v62  ;;  %v2784_v62 = vor.u32 %v3465_v50, %v2781_v53  ;;  %v3459_v24 = vld [vmem:[%s5346_s1 + $0x1a4] sm:$0xf]  ;;  %v2696_v25 = vor.u32 %v3443_v18, %v2693_v19  ;;  %v2885_v28 = vld [vmem:[%s5346_s1 + $0x2a8] sm:$0xf0]  ;;  %v2685_v32 = vld [vmem:[%s5346_s1 + $0x118] sm:$0xf0] }
  0x57   : > { %1135 = vmatpush.bf16.msra.mxu2 %v2632_v58  ;;  %v3447_v58 = vld [vmem:[%s5346_s1 + $0x144] sm:$0xf]  ;;  %v3473_v33 = vld [vmem:[%s5346_s1 + $0x214] sm:$0xf]  ;;  %v2749_v40 = vld [vmem:[%s5346_s1 + $0x198] sm:$0xf0] }
  0x58   : > { %1123 = vmatpush.bf16.msrb.mxu3 %v2560_v63  ;;  %v2912_v63 = vor.u32 %v3497_v54, %v2909_v55  ;;  %v3491_v27 = vld [vmem:[%s5346_s1 + $0x2a4] sm:$0xf]  ;;  %v3489_v41 = vld [vmem:[%s5346_s1 + $0x294] sm:$0xf]  ;;  %v2677_v46 = vld [vmem:[%s5346_s1 + $0x108] sm:$0xf0] }
  0x59   : > { %1097 = vmatpush.bf16.msrb.mxu1 %v2876_v8  ;;  %v3477_v8 = vld [vmem:[%s5346_s1 + $0x234] sm:$0xf]  ;;  %v2888_v36 = vor.u32 %v3491_v27, %v2885_v28  ;;  %v3439_v45 = vld [vmem:[%s5346_s1 + $0x104] sm:$0xf]  ;;  %v2933_v50 = vld [vmem:[%s5346_s1 + $0x308] sm:$0xf0] }
  0x5a   : > { %1085 = vmatpush.bf16.msrb.mxu0 %v2804_v16  ;;  %v2893_v16 = vld [vmem:[%s5346_s1 + $0x2b8] sm:$0xf0]  ;;  %v3471_v47 = vld [vmem:[%s5346_s1 + $0x204] sm:$0xf]  ;;  %v2680_v54 = vor.u32 %v3439_v45, %v2677_v46  ;;  %v2869_v60 = vld [vmem:[%s5346_s1 + $0x288] sm:$0xf0] }
  0x5b   : > { %1136 = vmatpush.bf16.msra.mxu2 %v2624_v12  ;;  %v3461_v12 = vld [vmem:[%s5346_s1 + $0x1b4] sm:$0xf]  ;;  %v2896_v23 = vor.u32 %v3493_v15, %v2893_v16  ;;  %v3455_v55 = vld [vmem:[%s5346_s1 + $0x184] sm:$0xf]  ;;  %v3512_v0 = vld [vmem:[%s5326_s3 + $0x38] sm:$0xff]  ;;  %s4866_s15 = scalar_lea.vmem [#allocation4], %s2542_s25 }
  0x5c   : > { %1124 = vmatpush.bf16.msrb.mxu3 %v2552_v17  ;;  %v2832_v17 = vor.u32 %v3477_v8, %v2829_v9  ;;  %v526_v6 = vld [vmem:[%s5348_s2] sm:$0x3]  ;;  %v3516_v27 = vld [vmem:[%s5326_s3 + $0x58] sm:$0xff]  ;;  %s2431_s19 = sshll.u32 %s4866_s15, 4  ;;  %s3709_s25 = scalar_lea.hbm %s3708_s16, 8  ;;  %s2432_s19 = int_to_ptr.vmem [resolvable:$true] %s2431_s19 }
  0x5d   : > { %1098 = vmatpush.bf16.msrb.mxu1 %v2868_v26  ;;  %1086 = vmatmul.bf16.vlgmr.msrb.gmra.mxu0 %v4350_v30  ;;  %v2757_v26 = vld [vmem:[%s5346_s1 + $0x1a8] sm:$0xf0]  ;;  %p3710_p11 = scmp.ne.s32.totalorder %s3708_s16, %s3709_s25  ;;  %p3715_p1 = scmp.lt.s32.totalorder %s3713_s26, %s3709_s25 }
  0x5e   : > { %1143 = vmatpush.bf16.msra.mxu0 %v2736_v21  ;;  %v2821_v21 = vld [vmem:[%s5346_s1 + $0x228] sm:$0xf0] }
  0x5f   : > { %1137 = vmatpush.bf16.msra.mxu2 %v2616_v31  ;;  %1125 = vmatmul.bf16.vlgmr.msrb.gmra.mxu3 %v4152_v57  ;;  %v2901_v57 = vld [vmem:[%s5346_s1 + $0x2c8] sm:$0xf0]  ;;  %v2824_v29 = vor.u32 %v3475_v20, %v2821_v21  ;;  %v3441_v31 = vld [vmem:[%s5346_s1 + $0x114] sm:$0xf]  ;;  %p3711_p12 = pnand %p3710_p11, %p3887_p5  ;;  %p3716_p2 = por %p3715_p1, %p3714_p0 }
  0x60   : > { %1169 = vmatpush.bf16.msra.mxu3 %v2864_v22  ;;  %1099 = vmatmul.bf16.vlgmr.msrb.gmra.mxu1 %v4361_v37  ;;  %v2904_v11 = vor.u32 %v3495_v2, %v2901_v57  ;;  %v2768_v22 = vor.u32 %v3461_v12, %v2765_v14  ;;  %v2688_v39 = vor.u32 %v3441_v31, %v2685_v32  ;;  %v3505_v57 = vld [vmem:[%s5326_s3] sm:$0xff]  ;;  %v3515_v32 = vld [vmem:[%s5326_s3 + $0x50] sm:$0xff] }
  0x61   : > { %1156 = vmatpush.bf16.msra.mxu1 %v2800_v34  ;;  %v2813_v34 = vld [vmem:[%s5346_s1 + $0x218] sm:$0xf0]  ;;  %p3712_p13 = pneg %p3711_p12 }
  0x62   : > { %1144 = vmatpush.bf16.msra.mxu0 %v2728_v38  ;;  %1138 = vmatmul.bf16.vlgmr.msra.gmra.mxu2 %v4175_v4  ;;  %v2712_v4 = vor.u32 %v3447_v58, %v2709_v59  ;;  %v3457_v38 = vld [vmem:[%s5346_s1 + $0x194] sm:$0xf]  ;;  %v2816_v44 = vor.u32 %v3473_v33, %v2813_v34  ;;  %v3487_v59 = vld [vmem:[%s5346_s1 + $0x284] sm:$0xf] }
  0x63   : > { %1182 = vmatpush.bf16.msrb.mxu2 %v2928_v35  ;;  %v2760_v35 = vor.u32 %v3459_v24, %v2757_v26  ;;  %p3717_p3 = pnand %p3716_p2, %p3712_p13 }
  0x64   : > { %1170 = vmatpush.bf16.msra.mxu3 %v2856_v42  ;;  %v2877_v42 = vld [vmem:[%s5346_s1 + $0x298] sm:$0xf0] }
  0x65   : > { %1157 = vmatpush.bf16.msra.mxu1 %v2792_v48  ;;  %v2805_v48 = vld [vmem:[%s5346_s1 + $0x208] sm:$0xf0]  ;;  %v2880_v53 = vor.u32 %v3489_v41, %v2877_v42  ;;  %v529_v42 = vperm.slane %v526_v6, 1 }
  0x66   : > { %1145 = vmatpush.bf16.msra.mxu0 %v2720_v52  ;;  %v2752_v52 = vor.u32 %v3457_v38, %v2749_v40  ;;  %v2808_v58 = vor.u32 %v3471_v47, %v2805_v48  ;;  %v3514_v38 = vld [vmem:[%s5326_s3 + $0x48] sm:$0xff] }
  0x67   : > { %1183 = vmatpush.bf16.msrb.mxu2 %v2920_v49  ;;  %v3503_v49 = vld [vmem:[%s5346_s1 + $0x304] sm:$0xf] }
  0x68   : > { %1171 = vmatpush.bf16.msra.mxu3 %v2848_v56  ;;  %v2741_v56 = vld [vmem:[%s5346_s1 + $0x188] sm:$0xf0]  ;;  %v2936_v61 = vor.u32 %v3503_v49, %v2933_v50 }
  0x69   : > { %1158 = vmatpush.bf16.msra.mxu1 %v2784_v62  ;;  %v2744_v62 = vor.u32 %v3455_v55, %v2741_v56 }
  0x6a   : > { %1146 = vmatpush.bf16.msra.mxu0 %v2712_v4  ;;  %v3511_v4 = vld [vmem:[%s5326_s3 + $0x30] sm:$0xff] }
  0x6b   : > { %1184 = vmatpush.bf16.msrb.mxu2 %v2912_v63  ;;  %v2872_v63 = vor.u32 %v3487_v59, %v2869_v60 }
  0x6c   : > { %1172 = vmatpush.bf16.msra.mxu3 %v2840_v5 }
  0x6d   : > { %1159 = vmatpush.bf16.msra.mxu1 %v2776_v10  ;;  %v528_v10 = vperm.slane %v526_v6, 0 }
  0x6e   : > { %1147 = vmatpush.bf16.msra.mxu0 %v2704_v13 }
  0x6f   : > { %1185 = vmatpush.bf16.msrb.mxu2 %v2904_v11 }
  0x70   : > { %1173 = vmatpush.bf16.msra.mxu3 %v2832_v17  ;;  %v1236_v17 = vld [vmem:[%s5326_s3 + $0x60] sm:$0xf] }
  0x71   : > { %1160 = vmatpush.bf16.msra.mxu1 %v2768_v22  ;;  %v1290_v18 = vunpack.c.l.b16 %v1236_v17  ;;  %v3024_v17 = vld [vmem:[%s5328_s5 + $0x48] sm:$0xf0] }
  0x72   : > { %1148 = vmatpush.bf16.msra.mxu0 %v2696_v25 }
  0x73   : > { %1186 = vmatpush.bf16.msrb.mxu2 %v2896_v23  ;;  %v1303_v20 = vpack.c.b16 %v1290_v18, %v1290_v18 }
  0x74   : > { %1174 = vmatpush.bf16.msra.mxu3 %v2824_v29 }
  0x75   : > { %1161 = vmatpush.bf16.msra.mxu1 %v2760_v35  ;;  %v1322_v24 = vsel %vm1320_vm1, %v1303_v20, 0  ;;  %v3014_v20 = vld [vmem:[%s5328_s5 + $0x30] sm:$0xf] }
  0x76   : > { %1149 = vmatpush.bf16.msra.mxu0 %v2688_v39  ;;  %v3513_v39 = vld [vmem:[%s5326_s3 + $0x40] sm:$0xff] }
  0x77   : > { %1187 = vmatpush.bf16.msrb.mxu2 %v2888_v36 }
  0x78   : > { %1175 = vmatpush.bf16.msra.mxu3 %v2816_v44 }
  0x79   : > { %1162 = vmatpush.bf16.msra.mxu1 %v2752_v52 }
  0x7a   : > { %1150 = vmatpush.bf16.msra.mxu0 %v2680_v54 }
  0x7b   : > { %1188 = vmatpush.bf16.msrb.mxu2 %v2880_v53 }
  0x7c   : > { %1176 = vmatpush.bf16.msra.mxu3 %v2808_v58 }
  0x7d   : > { %1163 = vmatpush.bf16.msra.mxu1 %v2744_v62  ;;  %1151 = vmatmul.bf16.vlgmr.msra.gmra.mxu0 %v4143_v51  ;;  %v3510_v51 = vld [vmem:[%s5326_s3 + $0x28] sm:$0xff] }
  0x7e   : > { %1202 = vmatpush.bf16.msrb.mxu0 %v2936_v61 }
  0x7f   : > { %1177 = vmatmul.bf16.vlgmr.msra.gmra.mxu3 %v4350_v30  ;;  %1189 = vmatpush.bf16.msrb.mxu2 %v2872_v63  ;;  %v3507_v30 = vld [vmem:[%s5326_s3 + $0x10] sm:$0xff] }
  0x80   : > { %1164 = vmatmul.bf16.vlgmr.msra.gmra.mxu1 %v4173_v3  ;;  %v3509_v3 = vld [vmem:[%s5326_s3 + $0x20] sm:$0xff]  ;;  %1340 = vmatpush.bf16.msrb.mxu3 %v1322_v24 }
  0x81   : > { %1324 = vmatpush.bf16.msrb.mxu1 %v3512_v0 }
  0x82   : > { %1190 = vmatmul.bf16.vlgmr.msrb.gmra.mxu2 %v4361_v37  ;;  %v3506_v37 = vld [vmem:[%s5326_s3 + $0x8] sm:$0xff] }
  0x84   : > { %1341 = vmatpush.bf16.msrb.mxu3 %v3516_v27  ;;  %v3522_v27 = vld [vmem:[%s5328_s5 + $0x24] sm:$0xf0] }
  0x85   : > { %1325 = vmatpush.bf16.msrb.mxu1 %v3511_v4  ;;  %v3046_v4 = vld [vmem:[%s5328_s5 + $0x70] sm:$0xf] }
  0x88   : > { %1342 = vmatpush.bf16.msrb.mxu3 %v3515_v32 }
  0x89   : > { %1326 = vmatpush.bf16.msrb.mxu1 %v3510_v51  ;;  %v3532_v51 = vld [vmem:[%s5328_s5 + $0x74] sm:$0xf0] }
  0x8c   : > { %1343 = vmatpush.bf16.msrb.mxu3 %v3514_v38  ;;  %v3519_v38 = vld [vmem:[%s5328_s5 + $0x14] sm:$0xf] }
  0x8d   : > { %2938 = vmatmul.msk.bf16.vlgmr.msrb.gmra.mxu0 %vm1022_vm0, %v4254_v43  ;;  %1327 = vmatpush.bf16.msrb.mxu1 %v3509_v3  ;;  %v3508_v43 = vld [vmem:[%s5326_s3 + $0x18] sm:$0xff]  ;;  %v3531_v3 = vld [vmem:[%s5328_s5 + $0x74] sm:$0xf] }
  0x90   : > { %1344 = vmatpush.bf16.msrb.mxu3 %v3513_v39 }
  0x91   : > { %1328 = vmatpush.bf16.msrb.mxu1 %v3508_v43  ;;  %v3047_v43 = vor.u32 %v3532_v51, %v3046_v4  ;;  %v3194_v51 = vld [vmem:[%s5330_s7 + $0x118] sm:$0xf] }
  0x93   : > { %1455 = vmatpush.bf16.msra.mxu0 %v3047_v43  ;;  %v3568_v43 = vld [vmem:[%s5330_s7 + $0x11c] sm:$0xf] }
  0x95   : > { %1329 = vmatpush.bf16.msrb.mxu1 %v3507_v30  ;;  %v3048_v30 = vld [vmem:[%s5328_s5 + $0x78] sm:$0xf0] }
  0x99   : > { %1330 = vmatpush.bf16.msrb.mxu1 %v3506_v37  ;;  %v3038_v37 = vld [vmem:[%s5328_s5 + $0x60] sm:$0xf] }
  0x9d   : > { %1331 = vmatpush.bf16.msrb.mxu1 %v3505_v57  ;;  %v3529_v57 = vld [vmem:[%s5328_s5 + $0x64] sm:$0xf] }
  0xba   : > { %v1035_v1 = vpop.f32.mrf.mxu0 }
  0xbb   : > { %v1036_v12 = vadd.f32 %v1035_v1, %v528_v10  ;;  %v3530_v1 = vld [vmem:[%s5328_s5 + $0x64] sm:$0xf0]  ;;  %v3527_v10 = vld [vmem:[%s5328_s5 + $0x54] sm:$0xf] }
  0xbc   : > { %v3039_v6 = vor.u32 %v3530_v1, %v3038_v37  ;;  %v3196_v37 = vld [vmem:[%s5330_s7 + $0x134] sm:$0xf0]  ;;  %v3362_v1 = vld [vmem:[%s5330_s7 + $0x268] sm:$0xf] }
  0xbd   : > { %v1048_v2 = vpop.f32.mrf.mxu1 }
  0xbe   : > { %v1049_v14 = vadd.f32 %v1048_v2, %v1036_v12  ;;  %v3051_v2 = vor.u32 %v3531_v3, %v3048_v30  ;;  %1456 = vmatpush.bf16.msra.mxu0 %v3039_v6  ;;  %v3571_v3 = vld [vmem:[%s5330_s7 + $0x130] sm:$0xf0] }
  0xbf   : > { %v3195_v6 = vor.u32 %v3571_v3, %v3194_v51 }
  0xc0   : > { %1468 = vmatpush.bf16.msra.mxu2 %v3051_v2  ;;  %v3613_v2 = vld [vmem:[%s5330_s7 + $0x280] sm:$0xf0] }
  0xc1   : > { %v1061_v5 = vpop.f32.mrf.mxu2 }
  0xc2   : > { %v1074_v7 = vpop.f32.mrf.mxu3  ;;  %v1037_v8 = vpop.f32.mrf.mxu0  ;;  %v1062_v16 = vadd.f32 %v1061_v5, %v1049_v14  ;;  %v3040_v5 = vld [vmem:[%s5328_s5 + $0x68] sm:$0xf0]  ;;  %v3022_v14 = vld [vmem:[%s5328_s5 + $0x40] sm:$0xf] }
  0xc3   : > { %v3030_v8 = vld [vmem:[%s5328_s5 + $0x50] sm:$0xf] }
  0xc4   : > { %v1075_v19 = vadd.f32 %v1074_v7, %v1062_v16  ;;  %v3043_v7 = vor.u32 %v3529_v57, %v3040_v5  ;;  %v3525_v16 = vld [vmem:[%s5328_s5 + $0x44] sm:$0xf] }
  0xc5   : > { %v1050_v9 = vpop.f32.mrf.mxu1 }
  0xc6   : > { %v3528_v9 = vld [vmem:[%s5328_s5 + $0x54] sm:$0xf0]  ;;  %1469 = vmatpush.bf16.msra.mxu2 %v3043_v7 }
  0xc7   : > { %v3031_v12 = vor.u32 %v3528_v9, %v3030_v8  ;;  %v3199_v8 = vor.u32 %v3568_v43, %v3196_v37  ;;  %v3363_v9 = vor.u32 %v3613_v2, %v3362_v1  ;;  %v1350_v37 = vld [vmem:[%s412_s12] sm:$0xff]  ;;  %s2404_s12 = scalar_lea.sflag [#allocation5], %s4770_s29 }
  0xc8   : > { %v3054_v2 = vld [vmem:[%s5330_s7] sm:$0xf] }
  0xc9   : > { %v1063_v11 = vpop.f32.mrf.mxu2  ;;  %1457 = vmatpush.bf16.msra.mxu0 %v3031_v12  ;;  %v3561_v12 = vld [vmem:[%s5330_s7 + $0xe4] sm:$0xf] }
  0xca   : > { %v1076_v13 = vpop.f32.mrf.mxu3  ;;  %v3032_v11 = vld [vmem:[%s5328_s5 + $0x58] sm:$0xf0] }
  0xcb   : > { %v3035_v13 = vor.u32 %v3527_v10, %v3032_v11  ;;  %v3166_v10 = vld [vmem:[%s5330_s7 + $0xe0] sm:$0xf]  ;;  %v3564_v11 = vld [vmem:[%s5330_s7 + $0xf8] sm:$0xf0] }
  0xcd   : > { %1470 = vmatpush.bf16.msra.mxu2 %v3035_v13  ;;  %v3168_v13 = vld [vmem:[%s5330_s7 + $0xfc] sm:$0xf0] }
  0xd1   : > { %v1113_v15 = vpop.f32.mrf.mxu2 }
  0xd9   : > { %v1115_v23 = vpop.f32.mrf.mxu2 }
  0xda   : > { %v1087_v21 = vpop.f32.mrf.mxu0  ;;  %v3016_v23 = vld [vmem:[%s5328_s5 + $0x38] sm:$0xf0] }
  0xdb   : > { %v1088_v22 = vadd.f32 %v1087_v21, %v1075_v19  ;;  %v3027_v19 = vor.u32 %v3525_v16, %v3024_v17  ;;  %v3524_v21 = vld [vmem:[%s5328_s5 + $0x34] sm:$0xf0]  ;;  %v3167_v16 = vor.u32 %v3564_v11, %v3166_v10  ;;  %v3610_v17 = vld [vmem:[%s5330_s7 + $0x26c] sm:$0xf]  ;;  %v3587_v10 = vld [vmem:[%s5330_s7 + $0x1b0] sm:$0xf0] }
  0xdc   : > { %v3015_v24 = vor.u32 %v3524_v21, %v3014_v20  ;;  %v3138_v21 = vld [vmem:[%s5330_s7 + $0xa8] sm:$0xf]  ;;  %v3202_v11 = vld [vmem:[%s5330_s7 + $0x120] sm:$0xf] }
  0xdd   : > { %v1100_v25 = vpop.f32.mrf.mxu1  ;;  %1471 = vmatpush.bf16.msra.mxu2 %v3027_v19  ;;  %v3171_v19 = vor.u32 %v3561_v12, %v3168_v13  ;;  %v3572_v13 = vld [vmem:[%s5330_s7 + $0x138] sm:$0xf0] }
  0xde   : > { %v1101_v26 = vadd.f32 %v1100_v25, %v1088_v22  ;;  %v3523_v22 = vld [vmem:[%s5328_s5 + $0x34] sm:$0xf] }
  0xdf   : > { %v3019_v25 = vor.u32 %v3523_v22, %v3016_v23  ;;  %v3557_v22 = vld [vmem:[%s5330_s7 + $0xc0] sm:$0xf0]  ;;  %v3554_v23 = vld [vmem:[%s5330_s7 + $0xac] sm:$0xf] }
  0xe0   : > { %v1114_v28 = vadd.f32 %v1113_v15, %v1101_v26  ;;  %v3526_v15 = vld [vmem:[%s5328_s5 + $0x44] sm:$0xf0]  ;;  %v3006_v26 = vld [vmem:[%s5328_s5 + $0x20] sm:$0xf] }
  0xe1   : > { %v3023_v18 = vor.u32 %v3526_v15, %v3022_v14  ;;  %1472 = vmatpush.bf16.msra.mxu2 %v3019_v25  ;;  %v3334_v14 = vld [vmem:[%s5330_s7 + $0x230] sm:$0xf]  ;;  %v3606_v15 = vld [vmem:[%s5330_s7 + $0x248] sm:$0xf0]  ;;  %v3140_v25 = vld [vmem:[%s5330_s7 + $0xc4] sm:$0xf0] }
  0xe2   : > { %v1208_v29 = vmax.f32 %v1114_v28, 0.0  ;;  %v1089_v31 = vpop.f32.mrf.mxu0  ;;  %v1126_v35 = vpop.f32.mrf.mxu3  ;;  %v3521_v28 = vld [vmem:[%s5328_s5 + $0x24] sm:$0xf]  ;;  %v3335_v20 = vor.u32 %v3606_v15, %v3334_v14  ;;  %v3583_v14 = vld [vmem:[%s5330_s7 + $0x194] sm:$0xf] }
  0xe3   : > { %v1127_v44 = vadd.f32 %v1126_v35, %v529_v42  ;;  %1458 = vmatpush.bf16.msra.mxu0 %v3023_v18  ;;  %v3007_v31 = vor.u32 %v3522_v27, %v3006_v26  ;;  %v2998_v35 = vld [vmem:[%s5328_s5 + $0x10] sm:$0xf]  ;;  %v2990_v42 = vld [vmem:[%s5328_s5] sm:$0xf]  ;;  %v3364_v18 = vld [vmem:[%s5330_s7 + $0x284] sm:$0xf0] }
  0xe4   : > { %v1210_v33 = vpack.c.bf16 %v1208_v29, %v1208_v29  ;;  %v3008_v29 = vld [vmem:[%s5328_s5 + $0x28] sm:$0xf0]  ;;  %v3306_v26 = vld [vmem:[%s5330_s7 + $0x1f8] sm:$0xf]  ;;  %v3599_v27 = vld [vmem:[%s5330_s7 + $0x210] sm:$0xf0] }
  0xe5   : > { %v1139_v34 = vpop.f32.mrf.mxu2  ;;  %v1102_v36 = vpop.f32.mrf.mxu1  ;;  %v3011_v32 = vor.u32 %v3521_v28, %v3008_v29  ;;  %v3603_v28 = vld [vmem:[%s5330_s7 + $0x234] sm:$0xf]  ;;  %v3336_v29 = vld [vmem:[%s5330_s7 + $0x24c] sm:$0xf0] }
  0xe6   : > { %1332 = vmatmul.bf16.vlgmr.msrb.gmra.mxu1 %v1210_v33  ;;  %v1140_v46 = vadd.f32 %v1139_v34, %v1127_v44  ;;  %v3520_v36 = vld [vmem:[%s5328_s5 + $0x14] sm:$0xf0]  ;;  %v3518_v44 = vld [vmem:[%s5328_s5 + $0x4] sm:$0xf0]  ;;  %v3260_v15 = vld [vmem:[%s5330_s7 + $0x1ac] sm:$0xf0] }
  0xe7   : > { %1459 = vmatpush.bf16.msra.mxu0 %v3015_v24  ;;  %1473 = vmatpush.bf16.msra.mxu2 %v3011_v32  ;;  %v2999_v39 = vor.u32 %v3520_v36, %v2998_v35  ;;  %v3367_v24 = vor.u32 %v3610_v17, %v3364_v18  ;;  %v3110_v32 = vld [vmem:[%s5330_s7 + $0x70] sm:$0xf]  ;;  %v3143_v35 = vor.u32 %v3554_v23, %v3140_v25  ;;  %v3580_v25 = vld [vmem:[%s5330_s7 + $0x178] sm:$0xf0] }
  0xe8   : > { %v3307_v36 = vor.u32 %v3599_v27, %v3306_v26  ;;  %v3203_v23 = vor.u32 %v3572_v13, %v3202_v11  ;;  %v3263_v26 = vor.u32 %v3583_v14, %v3260_v15  ;;  %v3174_v27 = vld [vmem:[%s5330_s7 + $0xe8] sm:$0xf]  ;;  %v3148_v13 = vld [vmem:[%s5330_s7 + $0xcc] sm:$0xf0] }
  0xe9   : > { %v3098_v15 = vld [vmem:[%s5330_s7 + $0x48] sm:$0xf] }
  0xea   : > { %v1128_v41 = vpop.f32.mrf.mxu3 }
  0xeb   : > { %1460 = vmatpush.bf16.msra.mxu0 %v3007_v31  ;;  %v3139_v31 = vor.u32 %v3557_v22, %v3138_v21  ;;  %v3614_v21 = vld [vmem:[%s5330_s7 + $0x288] sm:$0xf0] }
  0xed   : > { %v1141_v40 = vpop.f32.mrf.mxu2 }
  0xee   : > { %v3000_v40 = vld [vmem:[%s5328_s5 + $0x18] sm:$0xf0] }
  0xef   : > { %v3003_v41 = vor.u32 %v3519_v38, %v3000_v40  ;;  %1461 = vmatpush.bf16.msra.mxu0 %v2999_v39  ;;  %v3550_v38 = vld [vmem:[%s5330_s7 + $0x88] sm:$0xf0]  ;;  %v3547_v39 = vld [vmem:[%s5330_s7 + $0x74] sm:$0xf]  ;;  %v3112_v40 = vld [vmem:[%s5330_s7 + $0x8c] sm:$0xf0] }
  0xf1   : > { %1474 = vmatpush.bf16.msra.mxu2 %v3003_v41  ;;  %v3278_v41 = vld [vmem:[%s5330_s7 + $0x1c0] sm:$0xf] }
  0xfa   : > { %v1152_v45 = vpop.f32.mrf.mxu0 }
  0xfb   : > { %v1153_v48 = vadd.f32 %v1152_v45, %v1140_v46  ;;  %v3517_v45 = vld [vmem:[%s5328_s5 + $0x4] sm:$0xf]  ;;  %v2991_v46 = vor.u32 %v3518_v44, %v2990_v42  ;;  %v3592_v42 = vld [vmem:[%s5330_s7 + $0x1d8] sm:$0xf0] }
  0xfc   : > { %v3596_v44 = vld [vmem:[%s5330_s7 + $0x1fc] sm:$0xf] }
  0xfd   : > { %v1165_v47 = vpop.f32.mrf.mxu1  ;;  %1462 = vmatpush.bf16.msra.mxu0 %v2991_v46  ;;  %v3586_v46 = vld [vmem:[%s5330_s7 + $0x1a8] sm:$0xf0] }
  0xfe   : > { %v1166_v52 = vadd.f32 %v1165_v47, %v1153_v48  ;;  %v2992_v47 = vld [vmem:[%s5328_s5 + $0x8] sm:$0xf0] }
  0xff   : > { %v2995_v48 = vor.u32 %v3517_v45, %v2992_v47  ;;  %v3258_v45 = vld [vmem:[%s5330_s7 + $0x190] sm:$0xf]  ;;  %v3308_v47 = vld [vmem:[%s5330_s7 + $0x214] sm:$0xf0] }
 0x101   : > { %1475 = vmatpush.bf16.msra.mxu2 %v2995_v48  ;;  %v3664_v48 = vld [vmem:[%s5327_s4] ss:$0 sm:$0xff] }
 0x102   : > { %v1178_v49 = vpop.f32.mrf.mxu3  ;;  %v1154_v50 = vpop.f32.mrf.mxu0 }
 0x103   : > { %v1179_v54 = vadd.f32 %v1178_v49, %v1166_v52  ;;  %v3250_v49 = vld [vmem:[%s5330_s7 + $0x188] sm:$0xf]  ;;  %v3585_v50 = vld [vmem:[%s5330_s7 + $0x1a0] sm:$0xf0]  ;;  %v3582_v52 = vld [vmem:[%s5330_s7 + $0x18c] sm:$0xf] }
 0x105   : > { %v1191_v53 = vpop.f32.mrf.mxu2  ;;  %v1167_v55 = vpop.f32.mrf.mxu1 }
 0x106   : > { %v1192_v56 = vadd.f32 %v1191_v53, %v1179_v54  ;;  %v3251_v53 = vor.u32 %v3585_v50, %v3250_v49  ;;  %v3252_v54 = vld [vmem:[%s5330_s7 + $0x1a4] sm:$0xf0]  ;;  %v3222_v55 = vld [vmem:[%s5330_s7 + $0x150] sm:$0xf]  ;;  %v3111_v49 = vor.u32 %v3550_v38, %v3110_v32  ;;  %v3082_v50 = vld [vmem:[%s5330_s7 + $0x38] sm:$0xf] }
 0x107   : > { %v3210_v38 = vld [vmem:[%s5330_s7 + $0x128] sm:$0xf] }
 0x108   : > { %2075 = vmatpush.bf16.msra.mxu3 %v3251_v53  ;;  %v3311_v53 = vor.u32 %v3596_v44, %v3308_v47  ;;  %v3558_v44 = vld [vmem:[%s5330_s7 + $0xc8] sm:$0xf0]  ;;  %v3232_v47 = vld [vmem:[%s5330_s7 + $0x174] sm:$0xf0] }
 0x10a   : > { %v1180_v58 = vpop.f32.mrf.mxu3  ;;  %v1204_v59 = vpop.f32.mrf.mxu0 }
 0x10b   : > { %v1205_v60 = vadd.f32 %v1204_v59, %v1192_v56  ;;  %v3578_v56 = vld [vmem:[%s5330_s7 + $0x168] sm:$0xf0]  ;;  %v3255_v58 = vor.u32 %v3582_v52, %v3252_v54  ;;  %v3575_v59 = vld [vmem:[%s5330_s7 + $0x154] sm:$0xf]  ;;  %v3115_v54 = vor.u32 %v3547_v39, %v3112_v40  ;;  %v3573_v39 = vld [vmem:[%s5330_s7 + $0x140] sm:$0xf0] }
 0x10c   : > { %v4812_v52 = vld [vmem:[%s5330_s7 + $0x2a8] sm:$0xff] }
 0x10d   : > { %v1193_v61 = vpop.f32.mrf.mxu2  ;;  %v1209_v62 = vmax.f32 %v1205_v60, 0.0  ;;  %v3224_v60 = vld [vmem:[%s5330_s7 + $0x16c] sm:$0xf0]  ;;  %2101 = vmatpush.bf16.msrb.mxu0 %v3255_v58  ;;  %v3589_v58 = vld [vmem:[%s5330_s7 + $0x1c4] sm:$0xf] }
 0x10e   : > { %v1581_v61 = vld [vmem:[%s5330_s7 + $0x2a0] sm:$0xff]  ;;  %v3227_v4 = vor.u32 %v3575_v59, %v3224_v60  ;;  %v3259_v60 = vor.u32 %v3586_v46, %v3258_v45  ;;  %v3576_v46 = vld [vmem:[%s5330_s7 + $0x15c] sm:$0xf] }
 0x10f   : > { %v1211_v63 = vpack.c.bf16 %v1209_v62, %v1209_v62  ;;  %v3223_v62 = vor.u32 %v3578_v56, %v3222_v55  ;;  %v3279_v55 = vor.u32 %v3592_v42, %v3278_v41  ;;  %v3543_v56 = vld [vmem:[%s5330_s7 + $0x50] sm:$0xf0]  ;;  %v3280_v59 = vld [vmem:[%s5330_s7 + $0x1dc] sm:$0xf0]  ;;  %v3211_v41 = vor.u32 %v3573_v39, %v3210_v38  ;;  %v3146_v42 = vld [vmem:[%s5330_s7 + $0xb0] sm:$0xf] }
 0x110   : > { %v3283_v51 = vor.u32 %v3589_v58, %v3280_v59  ;;  %v3083_v43 = vor.u32 %v3543_v56, %v3082_v50  ;;  %v3147_v45 = vor.u32 %v3558_v44, %v3146_v42  ;;  %v3600_v50 = vld [vmem:[%s5330_s7 + $0x218] sm:$0xf0]  ;;  %v3118_v58 = vld [vmem:[%s5330_s7 + $0x78] sm:$0xf]  ;;  %v3551_v59 = vld [vmem:[%s5330_s7 + $0x90] sm:$0xf0] }
 0x111   : > { %2987 = vmatmul.msk.bf16.vlgmr.msrb.gmra.mxu3 %vm1316_vm2, %v1211_v63  ;;  %v1869_v63 = vunpack.c.l.b16 %v1581_v61  ;;  %2102 = vmatpush.bf16.msrb.mxu0 %v3227_v4  ;;  %v1871_v4 = vunpack.c.l.b16 %v4812_v52  ;;  %v1583_v39 = vld [vmem:[%s5330_s7 + $0x2b0] sm:$0xff] }
 0x112   : > { %v1206_v0 = vpop.f32.mrf.mxu0  ;;  %2076 = vmatpush.bf16.msra.mxu3 %v3223_v62  ;;  %v3084_v62 = vld [vmem:[%s5330_s7 + $0x54] sm:$0xf0] }
 0x113   : > { %v1870_v0 = vunpack.c.h.b16 %v1581_v61  ;;  %v1960_v30 = vpack.c.b16 %v1869_v63, %v1869_v63  ;;  %v3540_v61 = vld [vmem:[%s5330_s7 + $0x3c] sm:$0xf]  ;;  %v3230_v63 = vld [vmem:[%s5330_s7 + $0x158] sm:$0xf] }
 0x114   : > { %v3087_v1 = vor.u32 %v3540_v61, %v3084_v62  ;;  %v3569_v61 = vld [vmem:[%s5330_s7 + $0x124] sm:$0xf]  ;;  %v3204_v62 = vld [vmem:[%s5330_s7 + $0x13c] sm:$0xf0] }
 0x115   : > { %v1961_v57 = vpack.c.b16 %v1870_v0, %v1870_v0  ;;  %v2055_v5 = vsel %vm1320_vm1, %v1960_v30, 0  ;;  %2103 = vmatpush.bf16.msrb.mxu0 %v3199_v8  ;;  %v3579_v0 = vld [vmem:[%s5330_s7 + $0x170] sm:$0xf0]  ;;  %v1962_v8 = vpack.c.b16 %v1871_v4, %v1871_v4  ;;  %v3593_v4 = vld [vmem:[%s5330_s7 + $0x1e0] sm:$0xf0] }
 0x116   : > { %2091 = vmatpush.bf16.msra.mxu1 %v2055_v5  ;;  %2077 = vmatpush.bf16.msra.mxu3 %v3195_v6  ;;  %v3231_v5 = vor.u32 %v3579_v0, %v3230_v63  ;;  %v3536_v6 = vld [vmem:[%s5330_s7 + $0x18] sm:$0xf0]  ;;  %v3207_v63 = vor.u32 %v3569_v61, %v3204_v62  ;;  %v3286_v0 = vld [vmem:[%s5330_s7 + $0x1c8] sm:$0xf] }
 0x117   : > { %v2058_v7 = vsel %vm1320_vm1, %v1961_v57, 0  ;;  %v2061_v22 = vsel %vm1320_vm1, %v1962_v8, 0  ;;  %v3062_v8 = vld [vmem:[%s5330_s7 + $0x8] sm:$0xf] }
 0x118   : > { %2117 = vmatpush.bf16.msrb.mxu2 %v2058_v7  ;;  %v3056_v7 = vld [vmem:[%s5330_s7 + $0x1c] sm:$0xf0] }
 0x119   : > { %2104 = vmatpush.bf16.msrb.mxu0 %v3171_v19 }
 0x11a   : > { %2092 = vmatpush.bf16.msra.mxu1 %v3363_v9  ;;  %2078 = vmatpush.bf16.msra.mxu3 %v3167_v16  ;;  %v3266_v9 = vld [vmem:[%s5330_s7 + $0x198] sm:$0xf]  ;;  %v3055_v16 = vor.u32 %v3536_v6, %v3054_v2 }
 0x11b   : > { %v3267_v19 = vor.u32 %v3587_v10, %v3266_v9  ;;  %v3537_v9 = vld [vmem:[%s5330_s7 + $0x20] sm:$0xf0] }
 0x11c   : > { %2118 = vmatpush.bf16.msrb.mxu2 %v3367_v24  ;;  %v3238_v24 = vld [vmem:[%s5330_s7 + $0x160] sm:$0xf]  ;;  %v3063_v11 = vor.u32 %v3537_v9, %v3062_v8 }
 0x11d   : > { %2105 = vmatpush.bf16.msrb.mxu0 %v3143_v35  ;;  %v3239_v32 = vor.u32 %v3580_v25, %v3238_v24  ;;  %v3541_v24 = vld [vmem:[%s5330_s7 + $0x44] sm:$0xf]  ;;  %v3092_v25 = vld [vmem:[%s5330_s7 + $0x5c] sm:$0xf0] }
 0x11e   : > { %2093 = vmatpush.bf16.msra.mxu1 %v3335_v20  ;;  %2079 = vmatpush.bf16.msra.mxu3 %v3139_v31  ;;  %v3370_v20 = vld [vmem:[%s5330_s7 + $0x270] sm:$0xf]  ;;  %v3316_v9 = vld [vmem:[%s5330_s7 + $0x21c] sm:$0xf0] }
 0x11f   : > { %v3371_v31 = vor.u32 %v3614_v21, %v3370_v20  ;;  %v3070_v21 = vld [vmem:[%s5330_s7 + $0x10] sm:$0xf] }
 0x121   : > { %2106 = vmatpush.bf16.msrb.mxu0 %v3115_v54  ;;  %v3182_v54 = vld [vmem:[%s5330_s7 + $0xf0] sm:$0xf] }
 0x122   : > { %2094 = vmatpush.bf16.msra.mxu1 %v3307_v36  ;;  %2080 = vmatpush.bf16.msra.mxu3 %v3111_v49  ;;  %v3607_v36 = vld [vmem:[%s5330_s7 + $0x250] sm:$0xf0]  ;;  %v3314_v49 = vld [vmem:[%s5330_s7 + $0x200] sm:$0xf] }
 0x125   : > { %2107 = vmatpush.bf16.msrb.mxu0 %v3087_v1  ;;  %v3544_v1 = vld [vmem:[%s5330_s7 + $0x58] sm:$0xf0] }
 0x126   : > { %2095 = vmatpush.bf16.msra.mxu1 %v3279_v55  ;;  %2081 = vmatpush.bf16.msra.mxu3 %v3083_v43  ;;  %v3566_v55 = vld [vmem:[%s5330_s7 + $0x108] sm:$0xf0]  ;;  %v3559_v43 = vld [vmem:[%s5330_s7 + $0xd0] sm:$0xf0] }
 0x127   : > { %v3183_v56 = vor.u32 %v3566_v55, %v3182_v54  ;;  %v3386_v54 = vld [vmem:[%s5330_s7 + $0x280] sm:$0xf]  ;;  %v3616_v55 = vld [vmem:[%s5330_s7 + $0x298] sm:$0xf0] }
 0x12a   : > { %2127 = vmatpush.bf16.msrb.mxu1 %v3259_v60  ;;  %2082 = vmatpush.bf16.msra.mxu3 %v3055_v16  ;;  %v3119_v60 = vor.u32 %v3551_v59, %v3118_v58  ;;  %v3545_v16 = vld [vmem:[%s5330_s7 + $0x60] sm:$0xf0] }
 0x12e   : > { %2128 = vmatpush.bf16.msrb.mxu1 %v3231_v5  ;;  %2143 = vmatpush.bf16.msrb.mxu3 %v2061_v22  ;;  %v3176_v5 = vld [vmem:[%s5330_s7 + $0x104] sm:$0xf0]  ;;  %v3538_v22 = vld [vmem:[%s5330_s7 + $0x28] sm:$0xf0] }
 0x132   : > { %2129 = vmatpush.bf16.msrb.mxu1 %v3203_v23  ;;  %2144 = vmatpush.bf16.msrb.mxu3 %v3371_v31  ;;  %v3071_v23 = vor.u32 %v3538_v22, %v3070_v21  ;;  %v1369_v31 = vld [vmem:[%s5329_s6] sm:$0x3]  ;;  %v3288_v22 = vld [vmem:[%s5330_s7 + $0x1e4] sm:$0xf0] }
 0x163   : > { %v4648_v33 = vpop.f32.mrf.mxu1 }
 0x164   : > { %v1334_v3 = vadd.f32 %v3664_v48, %v4648_v33  ;;  %v3533_v33 = vld [vmem:[%s5330_s7 + $0x4] sm:$0xf]  ;;  %v3235_v48 = vor.u32 %v3576_v46, %v3232_v47  ;;  %v1873_v46 = vunpack.c.l.b16 %v1583_v39  ;;  %v1874_v47 = vunpack.c.h.b16 %v1583_v39 }
 0x165   : > { %v3059_v17 = vor.u32 %v3533_v33, %v3056_v7  ;;  %v3126_v33 = vld [vmem:[%s5330_s7 + $0x80] sm:$0xf]  ;;  %v3552_v7 = vld [vmem:[%s5330_s7 + $0x98] sm:$0xf0] }
 0x166   : > { %v3127_v10 = vor.u32 %v3552_v7, %v3126_v33  ;;  %v1964_v59 = vpack.c.b16 %v1873_v46, %v1873_v46  ;;  %v3597_v7 = vld [vmem:[%s5330_s7 + $0x204] sm:$0xf]  ;;  %v3274_v46 = vld [vmem:[%s5330_s7 + $0x1a0] sm:$0xf] }
 0x167   : > { %2108 = vmatpush.bf16.msrb.mxu0 %v3059_v17  ;;  %v3099_v17 = vor.u32 %v3545_v16, %v3098_v15  ;;  %v3608_v16 = vld [vmem:[%s5330_s7 + $0x258] sm:$0xf0] }
 0x16b   : > { %v1335_v34 = vpop.f32.mrf.mxu1 }
 0x16c   : > { %v3339_v34 = vor.u32 %v3603_v28, %v3336_v29  ;;  %v3565_v28 = vld [vmem:[%s5330_s7 + $0x100] sm:$0xf0] }
 0x16d   : > { %v3175_v35 = vor.u32 %v3565_v28, %v3174_v27  ;;  %v3534_v27 = vld [vmem:[%s5330_s7 + $0xc] sm:$0xf]  ;;  %v3064_v28 = vld [vmem:[%s5330_s7 + $0x24] sm:$0xf0] }
 0x16e   : > { %2119 = vmatpush.bf16.msrb.mxu2 %v3339_v34  ;;  %v3342_v34 = vld [vmem:[%s5330_s7 + $0x238] sm:$0xf] }
 0x16f   : > { %v3343_v40 = vor.u32 %v3607_v36, %v3342_v34  ;;  %2130 = vmatpush.bf16.msrb.mxu1 %v3175_v35  ;;  %v1371_v34 = vperm.slane %v1369_v31, 0  ;;  %v1872_v35 = vunpack.c.h.b16 %v4812_v52  ;;  %v3372_v52 = vld [vmem:[%s5330_s7 + $0x28c] sm:$0xf0] }
 0x171   : > { %2145 = vmatpush.bf16.msrb.mxu3 %v3343_v40 }
 0x172   : > { %2120 = vmatpush.bf16.msrb.mxu2 %v3311_v53  ;;  %v3315_v53 = vor.u32 %v3600_v50, %v3314_v49 }
 0x173   : > { %2131 = vmatpush.bf16.msrb.mxu1 %v3147_v45  ;;  %v1372_v45 = vperm.slane %v1369_v31, 1  ;;  %v3601_v31 = vld [vmem:[%s5330_s7 + $0x220] sm:$0xf0] }
 0x175   : > { %2146 = vmatpush.bf16.msrb.mxu3 %v3315_v53 }
 0x176   : > { %2121 = vmatpush.bf16.msrb.mxu2 %v3283_v51  ;;  %v3287_v51 = vor.u32 %v3593_v4, %v3286_v0  ;;  %v3344_v0 = vld [vmem:[%s5330_s7 + $0x254] sm:$0xf0]  ;;  %v3387_v4 = vor.u32 %v3616_v55, %v3386_v54  ;;  %v3570_v54 = vld [vmem:[%s5330_s7 + $0x12c] sm:$0xf]  ;;  %v3212_v55 = vld [vmem:[%s5330_s7 + $0x144] sm:$0xf0] }
 0x177   : > { %2132 = vmatpush.bf16.msrb.mxu1 %v3119_v60  ;;  %v1965_v60 = vpack.c.b16 %v1874_v47, %v1874_v47  ;;  %v3588_v47 = vld [vmem:[%s5330_s7 + $0x1b8] sm:$0xf0] }
 0x179   : > { %2147 = vmatpush.bf16.msrb.mxu3 %v3287_v51 }
 0x194   : > { %v1346_v30 = vpop.f32.mrf.mxu3 }
 0x195   : > { %v1347_v57 = vadd.f32 %v1346_v30, %v1334_v3  ;;  %v3154_v3 = vld [vmem:[%s5330_s7 + $0xb8] sm:$0xf] }
 0x196   : > { %v3155_v30 = vor.u32 %v3559_v43, %v3154_v3  ;;  %v3358_v3 = vld [vmem:[%s5330_s7 + $0x248] sm:$0xf]  ;;  %v3609_v43 = vld [vmem:[%s5330_s7 + $0x260] sm:$0xf0] }
 0x197   : > { %v1351_v12 = vmul.f32 %v1350_v37, %v1347_v57  ;;  %2397 = vst [vmem:[%s4866_s15] sm:$0xff] %v1347_v57  ;;  %v3090_v37 = vld [vmem:[%s5330_s7 + $0x40] sm:$0xf]  ;;  %v3562_v57 = vld [vmem:[%s5330_s7 + $0xec] sm:$0xf]  ;;  %v3359_v8 = vor.u32 %v3609_v43, %v3358_v3  ;;  %v3556_v43 = vld [vmem:[%s5330_s7 + $0xbc] sm:$0xf] }
 0x198   : > { %v3091_v2 = vor.u32 %v3544_v1, %v3090_v37  ;;  %v3179_v6 = vor.u32 %v3562_v57, %v3176_v5  ;;  %v3615_v37 = vld [vmem:[%s5330_s7 + $0x290] sm:$0xf0]  ;;  %v2070_v57 = vsel %vm1320_vm1, %v1965_v60, 0  ;;  %v3612_v5 = vld [vmem:[%s5330_s7 + $0x27c] sm:$0xf] }
 0x199   : > { %v1352_v18 = vpack.c.bf16 %v1351_v12, %v1351_v12  ;;  %v3555_v12 = vld [vmem:[%s5330_s7 + $0xb4] sm:$0xf]  ;;  %v3581_v60 = vld [vmem:[%s5330_s7 + $0x180] sm:$0xf0] }
 0x19a   : > { %2133 = vmatpush.bf16.msrb.mxu1 %v3091_v2  ;;  %v3151_v14 = vor.u32 %v3555_v12, %v3148_v13  ;;  %v2067_v2 = vsel %vm1320_vm1, %v1964_v59, 0  ;;  %v3246_v59 = vld [vmem:[%s5330_s7 + $0x168] sm:$0xf] }
 0x19b   : > { %1463 = vmatmul.bf16.vlgmr.msra.gmra.mxu0 %v1352_v18  ;;  %1476 = vmatmul.bf16.vlgmr.msra.gmra.mxu2 %v1352_v18  ;;  %v3548_v18 = vld [vmem:[%s5330_s7 + $0x7c] sm:$0xf] }
 0x19c   : > { %v1348_v29 = vpop.f32.mrf.mxu3  ;;  %2179 = vmatpush.bf16.msra.mxu0 %v3267_v19  ;;  %2153 = vmatpush.bf16.msra.mxu2 %v3263_v26  ;;  %v3120_v19 = vld [vmem:[%s5330_s7 + $0x94] sm:$0xf0]  ;;  %v3095_v26 = vor.u32 %v3541_v24, %v3092_v25  ;;  %v3595_v24 = vld [vmem:[%s5330_s7 + $0x1f0] sm:$0xf0] }
 0x19d   : > { %v3123_v20 = vor.u32 %v3548_v18, %v3120_v19  ;;  %v3067_v29 = vor.u32 %v3534_v27, %v3064_v28  ;;  %v3352_v18 = vld [vmem:[%s5330_s7 + $0x25c] sm:$0xf0]  ;;  %v3319_v19 = vor.u32 %v3597_v7, %v3316_v9  ;;  %v3268_v27 = vld [vmem:[%s5330_s7 + $0x1b4] sm:$0xf0]  ;;  %v3322_v28 = vld [vmem:[%s5330_s7 + $0x208] sm:$0xf] }
 0x19e   : > { %2134 = vmatpush.bf16.msrb.mxu1 %v3063_v11  ;;  %v3602_v11 = vld [vmem:[%s5330_s7 + $0x228] sm:$0xf0]  ;;  %v3323_v39 = vor.u32 %v3601_v31, %v3322_v28  ;;  %v3560_v9 = vld [vmem:[%s5330_s7 + $0xd8] sm:$0xf0] }
 0x1a0   : > { %2180 = vmatpush.bf16.msra.mxu0 %v3239_v32  ;;  %2154 = vmatpush.bf16.msra.mxu2 %v3235_v48  ;;  %v1584_v32 = vld [vmem:[%s5330_s7 + $0x2b8] sm:$0xf]  ;;  %v3611_v48 = vld [vmem:[%s5330_s7 + $0x274] sm:$0xf] }
 0x1a1   : > { %v1875_v36 = vunpack.c.l.b16 %v1584_v32  ;;  %v3375_v62 = vor.u32 %v3611_v48, %v3372_v52  ;;  %v3598_v32 = vld [vmem:[%s5330_s7 + $0x20c] sm:$0xf]  ;;  %v3591_v48 = vld [vmem:[%s5330_s7 + $0x1d4] sm:$0xf]  ;;  %v3296_v52 = vld [vmem:[%s5330_s7 + $0x1ec] sm:$0xf0] }
 0x1a3   : > { %v1966_v42 = vpack.c.b16 %v1875_v36, %v1875_v36 }
 0x1a4   : > { %2181 = vmatpush.bf16.msra.mxu0 %v3211_v41  ;;  %2155 = vmatpush.bf16.msra.mxu2 %v3207_v63  ;;  %v1963_v41 = vpack.c.b16 %v1872_v35, %v1872_v35  ;;  %v3604_v63 = vld [vmem:[%s5330_s7 + $0x23c] sm:$0xf] }
 0x1a5   : > { %v2073_v53 = vsel %vm1320_vm1, %v1966_v42, 0  ;;  %v3347_v33 = vor.u32 %v3604_v63, %v3344_v0  ;;  %v3184_v63 = vld [vmem:[%s5330_s7 + $0x10c] sm:$0xf0]  ;;  %v3247_v0 = vor.u32 %v3581_v60, %v3246_v59 }
 0x1a6   : > { %v2064_v50 = vsel %vm1320_vm1, %v1963_v41, 0  ;;  %v3240_v41 = vld [vmem:[%s5330_s7 + $0x17c] sm:$0xf0] }
 0x1a8   : > { %2182 = vmatpush.bf16.msra.mxu0 %v3183_v56  ;;  %2156 = vmatpush.bf16.msra.mxu2 %v3179_v6  ;;  %v3380_v6 = vld [vmem:[%s5330_s7 + $0x294] sm:$0xf0] }
 0x1a9   : > { %v3383_v15 = vor.u32 %v3612_v5, %v3380_v6  ;;  %v3549_v6 = vld [vmem:[%s5330_s7 + $0x84] sm:$0xf] }
 0x1ac   : > { %2183 = vmatpush.bf16.msra.mxu0 %v3155_v30  ;;  %2157 = vmatpush.bf16.msra.mxu2 %v3151_v14  ;;  %v3378_v30 = vld [vmem:[%s5330_s7 + $0x278] sm:$0xf]  ;;  %v3350_v14 = vld [vmem:[%s5330_s7 + $0x240] sm:$0xf] }
 0x1ad   : > { %v3379_v13 = vor.u32 %v3615_v37, %v3378_v30  ;;  %v3351_v25 = vor.u32 %v3608_v16, %v3350_v14  ;;  %v3156_v30 = vld [vmem:[%s5330_s7 + $0xd4] sm:$0xf0]  ;;  %v3134_v14 = vld [vmem:[%s5330_s7 + $0x88] sm:$0xf] }
 0x1ae   : > { %v3159_v5 = vor.u32 %v3556_v43, %v3156_v30 }
 0x1b0   : > { %2184 = vmatpush.bf16.msra.mxu0 %v3127_v10  ;;  %2158 = vmatpush.bf16.msra.mxu2 %v3123_v20  ;;  %v3330_v10 = vld [vmem:[%s5330_s7 + $0x210] sm:$0xf]  ;;  %v3590_v20 = vld [vmem:[%s5330_s7 + $0x1cc] sm:$0xf] }
 0x1b1   : > { %v3331_v21 = vor.u32 %v3602_v11, %v3330_v10  ;;  %v3291_v35 = vor.u32 %v3590_v20, %v3288_v22  ;;  %v3542_v11 = vld [vmem:[%s5330_s7 + $0x4c] sm:$0xf]  ;;  %v3106_v20 = vld [vmem:[%s5330_s7 + $0x50] sm:$0xf] }
 0x1b4   : > { %2185 = vmatpush.bf16.msra.mxu0 %v3099_v17  ;;  %2159 = vmatpush.bf16.msra.mxu2 %v3095_v26  ;;  %v3605_v17 = vld [vmem:[%s5330_s7 + $0x244] sm:$0xf]  ;;  %v3584_v26 = vld [vmem:[%s5330_s7 + $0x19c] sm:$0xf] }
 0x1b8   : > { %2186 = vmatpush.bf16.msra.mxu0 %v3071_v23  ;;  %2160 = vmatpush.bf16.msra.mxu2 %v3067_v29  ;;  %v3302_v23 = vld [vmem:[%s5330_s7 + $0x1d8] sm:$0xf]  ;;  %v3355_v29 = vor.u32 %v3605_v17, %v3352_v18  ;;  %v3535_v17 = vld [vmem:[%s5330_s7 + $0x14] sm:$0xf]  ;;  %v3072_v18 = vld [vmem:[%s5330_s7 + $0x2c] sm:$0xf0] }
 0x1b9   : > { %v3303_v36 = vor.u32 %v3595_v24, %v3302_v23  ;;  %v3078_v23 = vld [vmem:[%s5330_s7 + $0x18] sm:$0xf]  ;;  %v3539_v24 = vld [vmem:[%s5330_s7 + $0x30] sm:$0xf0] }
 0x218   : > { %v1464_v38 = vpop.f32.mrf.mxu0 }
 0x219   : > { %v1465_v40 = vadd.f32 %v1464_v38, %v1371_v34  ;;  %v3324_v34 = vld [vmem:[%s5330_s7 + $0x224] sm:$0xf0]  ;;  %v3271_v38 = vor.u32 %v3584_v26, %v3268_v27 }
 0x21a   : > { %v3327_v42 = vor.u32 %v3598_v32, %v3324_v34 }
 0x21b   : > { %v1481_v44 = vmax.f32 %v1465_v40, 0.0  ;;  %v3577_v40 = vld [vmem:[%s5330_s7 + $0x164] sm:$0xf] }
 0x21d   : > { %v5033_v49 = vpack.c.bf16 %v1481_v44, %v1481_v44  ;;  %v3294_v44 = vld [vmem:[%s5330_s7 + $0x1d0] sm:$0xf] }
 0x21e   : > { %v1477_v56 = vpop.f32.mrf.mxu2 }
 0x21f   : > { %v1478_v58 = vadd.f32 %v1477_v56, %v1372_v45  ;;  %2083 = vmatmul.bf16.vlgmr.msra.gmra.mxu3 %v5033_v49  ;;  %2109 = vmatmul.bf16.vlgmr.msrb.gmra.mxu0 %v5033_v49  ;;  %v3594_v45 = vld [vmem:[%s5330_s7 + $0x1e8] sm:$0xf0]  ;;  %v3275_v56 = vor.u32 %v3588_v47, %v3274_v46 }
 0x220   : > { %2169 = vmatpush.bf16.msra.mxu3 %v2064_v50  ;;  %v1466_v61 = vpop.f32.mrf.mxu0  ;;  %2247 = vmatpush.bf16.msrb.mxu0 %v2073_v53  ;;  %v3243_v50 = vor.u32 %v3577_v40, %v3240_v41  ;;  %v3295_v53 = vor.u32 %v3594_v45, %v3294_v44 }
 0x221   : > { %v1482_v51 = vmax.f32 %v1478_v58, 0.0  ;;  %v3299_v58 = vor.u32 %v3591_v48, %v3296_v52  ;;  %v3215_v61 = vor.u32 %v3570_v54, %v3212_v55 }
 0x223   : > { %v5063_v1 = vpack.c.bf16 %v1482_v51, %v1482_v51  ;;  %v3574_v51 = vld [vmem:[%s5330_s7 + $0x148] sm:$0xf0] }
 0x224   : > { %2170 = vmatpush.bf16.msra.mxu3 %v3375_v62  ;;  %2248 = vmatpush.bf16.msrb.mxu0 %v3387_v4  ;;  %v3563_v62 = vld [vmem:[%s5330_s7 + $0xf4] sm:$0xf]  ;;  %v3218_v4 = vld [vmem:[%s5330_s7 + $0x130] sm:$0xf] }
 0x225   : > { %3388 = vmatmul.msk.bf16.vlgmr.msra.gmra.mxu1 %vm1316_vm2, %v5063_v1  ;;  %3389 = vmatmul.msk.bf16.vlgmr.msrb.gmra.mxu2 %vm1316_vm2, %v5063_v1  ;;  %v3187_v3 = vor.u32 %v3563_v62, %v3184_v63  ;;  %v3219_v37 = vor.u32 %v3574_v51, %v3218_v4 }
 0x226   : > { %2195 = vmatpush.bf16.msra.mxu1 %v2067_v2  ;;  %v1479_v12 = vpop.f32.mrf.mxu2  ;;  %2221 = vmatpush.bf16.msrb.mxu2 %v2070_v57  ;;  %v3190_v2 = vld [vmem:[%s5330_s7 + $0xf8] sm:$0xf]  ;;  %v3567_v57 = vld [vmem:[%s5330_s7 + $0x110] sm:$0xf0] }
 0x227   : > { %v3191_v7 = vor.u32 %v3567_v57, %v3190_v2  ;;  %v3100_v12 = vld [vmem:[%s5330_s7 + $0x64] sm:$0xf0] }
 0x228   : > { %2171 = vmatpush.bf16.msra.mxu3 %v3347_v33  ;;  %2249 = vmatpush.bf16.msrb.mxu0 %v3359_v8  ;;  %v3128_v33 = vld [vmem:[%s5330_s7 + $0x9c] sm:$0xf0]  ;;  %v3103_v16 = vor.u32 %v3542_v11, %v3100_v12 }
 0x229   : > { %v3162_v8 = vld [vmem:[%s5330_s7 + $0xc0] sm:$0xf]  ;;  %v3131_v10 = vor.u32 %v3549_v6, %v3128_v33 }
 0x22a   : > { %2196 = vmatpush.bf16.msra.mxu1 %v3379_v13  ;;  %2222 = vmatpush.bf16.msrb.mxu2 %v3383_v15  ;;  %v3163_v13 = vor.u32 %v3560_v9, %v3162_v8  ;;  %v3553_v15 = vld [vmem:[%s5330_s7 + $0xa0] sm:$0xf0] }
 0x22c   : > { %2172 = vmatpush.bf16.msra.mxu3 %v3319_v19  ;;  %2250 = vmatpush.bf16.msrb.mxu0 %v3331_v21  ;;  %v3135_v19 = vor.u32 %v3553_v15, %v3134_v14  ;;  %v3075_v21 = vor.u32 %v3535_v17, %v3072_v18 }
 0x22e   : > { %2197 = vmatpush.bf16.msra.mxu1 %v3351_v25  ;;  %2223 = vmatpush.bf16.msrb.mxu2 %v3355_v29  ;;  %v3079_v25 = vor.u32 %v3539_v24, %v3078_v23 }
 0x22f   : > { %3390 = vmatmul.msk.bf16.vlgmr.msrb.gmra.mxu3 %vm1316_vm2, %v5063_v1  ;;  %2187 = vmatmul.bf16.vlgmr.msra.gmra.mxu0 %v5033_v49 }
 0x230   : > { %2173 = vmatpush.bf16.msra.mxu3 %v3291_v35  ;;  %2251 = vmatpush.bf16.msrb.mxu0 %v3303_v36 }
 0x232   : > { %2198 = vmatpush.bf16.msra.mxu1 %v3323_v39  ;;  %2224 = vmatpush.bf16.msrb.mxu2 %v3327_v42 }
 0x234   : > { %2205 = vmatpush.bf16.msrb.mxu3 %v3271_v38 }
 0x235   : > { %2135 = vmatmul.bf16.vlgmr.msrb.gmra.mxu1 %v5033_v49  ;;  %2161 = vmatmul.bf16.vlgmr.msra.gmra.mxu2 %v5033_v49 }
 0x236   : > { %2199 = vmatpush.bf16.msra.mxu1 %v3295_v53  ;;  %2225 = vmatpush.bf16.msrb.mxu2 %v3299_v58 }
 0x238   : > { %2206 = vmatpush.bf16.msrb.mxu3 %v3243_v50 }
 0x23a   : > { %2231 = vmatpush.bf16.msrb.mxu1 %v3275_v56 }
 0x23c   : > { %2207 = vmatpush.bf16.msrb.mxu3 %v3215_v61 }
 0x23e   : > { %2232 = vmatpush.bf16.msrb.mxu1 %v3247_v0 }
 0x23f   : > { %3391 = vmatmul.msk.bf16.vlgmr.msra.gmra.mxu3 %vm1316_vm2, %v5063_v1  ;;  %3394 = vmatmul.msk.bf16.vlgmr.msrb.gmra.mxu0 %vm1316_vm2, %v5063_v1 }
 0x240   : > { %2208 = vmatpush.bf16.msrb.mxu3 %v3187_v3 }
 0x242   : > { %2233 = vmatpush.bf16.msrb.mxu1 %v3219_v37 }
 0x244   : > { %2209 = vmatpush.bf16.msrb.mxu3 %v3159_v5 }
 0x245   : > { %3392 = vmatmul.msk.bf16.vlgmr.msra.gmra.mxu1 %vm1316_vm2, %v5063_v1  ;;  %3393 = vmatmul.msk.bf16.vlgmr.msrb.gmra.mxu2 %vm1316_vm2, %v5063_v1  ;;  %v3546_v1 = vld [vmem:[%s5330_s7 + $0x68] sm:$0xf0] }
 0x246   : > { %2234 = vmatpush.bf16.msrb.mxu1 %v3191_v7  ;;  %v3107_v22 = vor.u32 %v3546_v1, %v3106_v20 }
 0x248   : > { %2210 = vmatpush.bf16.msrb.mxu3 %v3131_v10 }
 0x24a   : > { %2235 = vmatpush.bf16.msrb.mxu1 %v3163_v13 }
 0x24c   : > { %2211 = vmatpush.bf16.msrb.mxu3 %v3103_v16 }
 0x24e   : > { %2236 = vmatpush.bf16.msrb.mxu1 %v3135_v19 }
 0x250   : > { %2212 = vmatpush.bf16.msrb.mxu3 %v3075_v21 }
 0x252   : > { %2237 = vmatpush.bf16.msrb.mxu1 %v3107_v22 }
 0x253   : > { %2213 = vmatmul.bf16.vlgmr.msrb.gmra.mxu3 %v5033_v49 }
 0x256   : > { %2238 = vmatpush.bf16.msrb.mxu1 %v3079_v25 }
 0x259   : > { %2239 = vmatmul.bf16.vlgmr.msrb.gmra.mxu1 %v5033_v49 }
 0x25a   : > { %3720 = shalt.err (!%p3717_p3)
}
 0x25b   : > { %3621 = dma.vmem_to_hbm [thread:$0]  (%p3887_p5), %s2432_s19, 128, %s2434_s14, %s2404_s12   ;;  %v5267_v26 = vld [vmem:[%s5331_s8] sm:$0x7f] }
 0x25c   : > { %v1587_v27 = vperm.slane %v5267_v26, 0  ;;  %v1588_v31 = vperm.slane %v5267_v26, 1  ;;  %v1589_v47 = vperm.slane %v5267_v26, 2  ;;  %v1591_v0 = vperm.slane %v5267_v26, 4  ;;  %s3617_s2 = smul.u32 56, %s4770_s29  ;;  %s2399_s16 = scalar_lea.sflag [#allocation3], %s4770_s29 }
 0x25d   : > { %v1590_v5 = vperm.slane %v5267_v26, 3  ;;  %s3619_s13 = smul.u32 56, %s3870_s21  ;;  %s3741_s0 = scalar_lea.hbm %s5333_s10, 224 }
 0x25e   : > { %s5277_s1 = scalar_lea.vmem [#allocation2], %s3617_s2 }
 0x25f   : > { %s2415_s14 = scalar_lea.hbm %s5333_s10, %s3619_s13  ;;  %s2417_s21 = sshll.u32 %s5277_s1, 4  ;;  %s2418_s21 = int_to_ptr.vmem [resolvable:$true] %s2417_s21 }
 0x260   : > { %s2419_s12 = sshll.u32 %s2415_s14, 4  ;;  %s2420_s12 = int_to_ptr.hbm [resolvable:$true] %s2419_s12 }
 0x261   : > { %s3735_s25 = sshra.s32 %s2420_s12, 4  ;;  %s3736_s25 = int_to_ptr.hbm [resolvable:$true] %s3735_s25 }
 0x262   : > { %s3737_s22 = scalar_lea.hbm %s3736_s25, 56  ;;  %p3742_p9 = scmp.lt.s32.totalorder %s3736_s25, %s5333_s10 }
 0x263   : > { %p3738_p4 = scmp.ne.s32.totalorder %s3736_s25, %s3737_s22  ;;  %p3743_p10 = scmp.lt.s32.totalorder %s3741_s0, %s3737_s22 }
 0x265   : > { %p3739_p7 = pnand %p3738_p4, %p3887_p5  ;;  %p3744_p11 = por %p3743_p10, %p3742_p9 }
 0x267   : > { %p3740_p8 = pneg %p3739_p7 }
 0x269   : > { %p3745_p12 = pnand %p3744_p11, %p3740_p8 }
 0x29c   : > { %v2110_v49 = vpop.f32.mrf.mxu0 }
 0x29d   : > { %v2111_v36 = vadd.f32 %v2110_v49, %v1588_v31 }
 0x2a2   : > { %v2084_v28 = vpop.f32.mrf.mxu3  ;;  %v2097_v29 = vpop.f32.mrf.mxu1 }
 0x2a3   : > { %v2085_v32 = vadd.f32 %v2084_v28, %v1587_v27 }
 0x2a4   : > { %v2112_v34 = vpop.f32.mrf.mxu0 }
 0x2a5   : > { %v2098_v35 = vadd.f32 %v2097_v29, %v2085_v32 }
 0x2a7   : > { %v3395_v38 = vmul.f32 -1.442695, %v2098_v35 }
 0x2a8   : > { %v2123_v39 = vpop.f32.mrf.mxu2 }
 0x2a9   : > { %3665 = vpow2.f32 %v3395_v38  ;;  %v2124_v40 = vadd.f32 %v2123_v39, %v2111_v36 }
 0x2aa   : > { %v2086_v41 = vpop.f32.mrf.mxu3  ;;  %v2099_v42 = vpop.f32.mrf.mxu1 }
 0x2ab   : > { %v3396_v44 = vmul.f32 -1.442695, %v2124_v40 }
 0x2ac   : > { %v2188_v45 = vpop.f32.mrf.mxu0 }
 0x2ad   : > { %3667 = vpow2.f32 %v3396_v44  ;;  %v2189_v33 = vadd.f32 %v2188_v45, %v1591_v0 }
 0x2af   : > { %v3666_v46 = vpop.eup %3665 }
 0x2b0   : > { %v2278_v48 = vadd.f32 1.0, %v3666_v46  ;;  %v2125_v52 = vpop.f32.mrf.mxu2 }
 0x2b1   : > { %v1593_v52 = vperm.slane %v5267_v26, 6 }
 0x2b2   : > { %3669 = vrcp.f32 %v2278_v48  ;;  %v2136_v50 = vpop.f32.mrf.mxu1  ;;  %v2149_v53 = vpop.f32.mrf.mxu3  ;;  %v2294_v43 = vand.u32 2147483647, %v2278_v48  ;;  %v2296_v37 = vand.u32 2147483648, %v2278_v48  ;;  %vm2290_vm4 = vweird.f32 %v2278_v48 }
 0x2b3   : > { %v3668_v54 = vpop.eup %3667  ;;  %v2137_v55 = vadd.f32 %v2136_v50, %v1589_v47 }
 0x2b4   : > { %v2279_v56 = vadd.f32 1.0, %v3668_v54  ;;  %v2190_v58 = vpop.f32.mrf.mxu0  ;;  %vm2295_vm5 = vcmp.eq.f32.partialorder %v2294_v43, 8.507059e+37  ;;  %v2297_v10 = vor.u32 1.1754944e-38, %v2296_v37 }
 0x2b5   : > { %v2150_v59 = vadd.f32 %v2149_v53, %v2137_v55 }
 0x2b6   : > { %3671 = vrcp.f32 %v2279_v56  ;;  %v2309_v11 = vand.u32 2147483647, %v2279_v56  ;;  %v2311_v12 = vand.u32 2147483648, %v2279_v56  ;;  %vm2305_vm8 = vweird.f32 %v2279_v56 }
 0x2b7   : > { %v3397_v60 = vmul.f32 -1.442695, %v2150_v59 }
 0x2b8   : > { %v3670_v61 = vpop.eup %3669  ;;  %v2162_v63 = vpop.f32.mrf.mxu2  ;;  %v2312_v23 = vor.u32 1.1754944e-38, %v2311_v12  ;;  %vm2310_vm10 = vcmp.eq.f32.partialorder %v2309_v11, 8.507059e+37 }
 0x2b9   : > { %v2286_v62 = vmul.f32 %v3670_v61, %v2278_v48  ;;  %3673 = vpow2.f32 %v3397_v60  ;;  %vm2291_vm3 = vweird.f32 %v3670_v61  ;;  %v2163_v16 = vadd.f32 %v2162_v63, %v1590_v5 }
 0x2ba   : > { %v2138_v4 = vpop.f32.mrf.mxu1  ;;  %v2151_v51 = vpop.f32.mrf.mxu3  ;;  %vm2292_vm6 = vmor %vm2290_vm4, %vm2291_vm3  ;;  %v1592_v48 = vperm.slane %v5267_v26, 5 }
 0x2bb   : > { %v2287_v3 = vsub.f32 1.0, %v2286_v62 }
 0x2bc   : > { %v3672_v30 = vpop.eup %3671  ;;  %v5275_v6 = vpop.f32.mrf.mxu0 }
 0x2bd   : > { %v2288_v2 = vmul.f32 %v3670_v61, %v2287_v3  ;;  %v2301_v57 = vmul.f32 %v3672_v30, %v2279_v56  ;;  %vm2306_vm7 = vweird.f32 %v3672_v30 }
 0x2be   : > { %vm2307_vm9 = vmor %vm2305_vm8, %vm2306_vm7 }
 0x2bf   : > { %v3674_v7 = vpop.eup %3673  ;;  %v2289_v8 = vadd.f32 %v3670_v61, %v2288_v2  ;;  %v2302_v9 = vsub.f32 1.0, %v2301_v57 }
 0x2c0   : > { %v2280_v13 = vadd.f32 1.0, %v3674_v7  ;;  %v2164_v17 = vpop.f32.mrf.mxu2 }
 0x2c1   : > { %v2293_v14 = vsel %vm2292_vm6, %v3670_v61, %v2289_v8  ;;  %v2303_v15 = vmul.f32 %v3672_v30, %v2302_v9 }
 0x2c2   : > { %v2298_v18 = vsel %vm2295_vm5, %v2297_v10, %v2293_v14  ;;  %3675 = vrcp.f32 %v2280_v13  ;;  %v2175_v19 = vpop.f32.mrf.mxu3  ;;  %v2201_v20 = vpop.f32.mrf.mxu1  ;;  %v2326_v38 = vand.u32 2147483648, %v2280_v13  ;;  %v2324_v41 = vand.u32 2147483647, %v2280_v13 }
 0x2c3   : > { %2390 = vst [vmem:[%s5277_s1] sm:$0xff] %v2298_v18  ;;  %v2304_v1 = vadd.f32 %v3672_v30, %v2303_v15  ;;  %v2176_v21 = vadd.f32 %v2175_v19, %v2163_v16  ;;  %v2202_v22 = vadd.f32 %v2201_v20, %v2189_v33  ;;  %vm2320_vm12 = vweird.f32 %v2280_v13 }
 0x2c4   : > { %v2255_v27 = vpop.f32.mrf.mxu0  ;;  %v2327_v47 = vor.u32 1.1754944e-38, %v2326_v38  ;;  %vm2325_vm14 = vcmp.eq.f32.partialorder %v2324_v41, 8.507059e+37 }
 0x2c5   : > { %v2308_v24 = vsel %vm2307_vm9, %v3672_v30, %v2304_v1  ;;  %v3398_v25 = vmul.f32 -1.442695, %v2176_v21  ;;  %v3399_v49 = vmul.f32 -1.442695, %v2202_v22 }
 0x2c6   : > { %v2313_v28 = vsel %vm2310_vm10, %v2312_v23, %v2308_v24 }
 0x2c7   : > { %2391 = vst [vmem:[%s5277_s1 + $0x8] sm:$0xff] %v2313_v28  ;;  %3677 = vpow2.f32 %v3398_v25 }
 0x2c8   : > { %v3676_v29 = vpop.eup %3675  ;;  %3679 = vpow2.f32 %v3399_v49  ;;  %v2227_v32 = vpop.f32.mrf.mxu2 }
 0x2c9   : > { %v2316_v31 = vmul.f32 %v3676_v29, %v2280_v13  ;;  %vm2321_vm11 = vweird.f32 %v3676_v29 }
 0x2ca   : > { %v2177_v34 = vpop.f32.mrf.mxu3  ;;  %v2203_v35 = vpop.f32.mrf.mxu1  ;;  %vm2322_vm13 = vmor %vm2320_vm12, %vm2321_vm11 }
 0x2cb   : > { %v2317_v36 = vsub.f32 1.0, %v2316_v31 }
 0x2cd   : > { %v3678_v39 = vpop.eup %3677  ;;  %v2318_v40 = vmul.f32 %v3676_v29, %v2317_v36 }
 0x2ce   : > { %v3680_v42 = vpop.eup %3679  ;;  %v2281_v44 = vadd.f32 1.0, %v3678_v39 }
 0x2cf   : > { %v2319_v45 = vadd.f32 %v3676_v29, %v2318_v40  ;;  %v2282_v46 = vadd.f32 1.0, %v3680_v42 }
 0x2d0   : > { %3681 = vrcp.f32 %v2281_v44  ;;  %v2229_v53 = vpop.f32.mrf.mxu2  ;;  %v2339_v43 = vand.u32 2147483647, %v2281_v44  ;;  %v2341_v30 = vand.u32 2147483648, %v2281_v44  ;;  %vm2335_vm2 = vweird.f32 %v2281_v44 }
 0x2d1   : > { %v2323_v50 = vsel %vm2322_vm13, %v3676_v29, %v2319_v45  ;;  %3683 = vrcp.f32 %v2282_v46  ;;  %v2356_v57 = vand.u32 2147483648, %v2282_v46  ;;  %v2354_v8 = vand.u32 2147483647, %v2282_v46 }
 0x2d2   : > { %v2328_v54 = vsel %vm2325_vm14, %v2327_v47, %v2323_v50  ;;  %v2342_v9 = vor.u32 1.1754944e-38, %v2341_v30  ;;  %vm2350_vm4 = vweird.f32 %v2282_v46  ;;  %vm2340_vm5 = vcmp.eq.f32.partialorder %v2339_v43, 8.507059e+37 }
 0x2d3   : > { %2392 = vst [vmem:[%s5277_s1 + $0x10] sm:$0xff] %v2328_v54  ;;  %v2357_v12 = vor.u32 1.1754944e-38, %v2356_v57  ;;  %vm2355_vm7 = vcmp.eq.f32.partialorder %v2354_v8, 8.507059e+37 }
 0x2d6   : > { %v2214_v55 = vpop.f32.mrf.mxu3  ;;  %v2240_v56 = vpop.f32.mrf.mxu1 }
 0x2d7   : > { %v2215_v58 = vadd.f32 %v2214_v55, %v1592_v48  ;;  %v2241_v59 = vadd.f32 %v2240_v56, %v1593_v52  ;;  %v3682_v60 = vpop.eup %3681 }
 0x2d8   : > { %v3684_v63 = vpop.eup %3683  ;;  %v2331_v0 = vmul.f32 %v3682_v60, %v2281_v44  ;;  %vm2336_vm15 = vweird.f32 %v3682_v60 }
 0x2d9   : > { %v2228_v61 = vadd.f32 %v2227_v32, %v2215_v58  ;;  %v2254_v62 = vadd.f32 %v5275_v6, %v2241_v59  ;;  %v2346_v4 = vmul.f32 %v3684_v63, %v2282_v46  ;;  %vm2351_vm1 = vweird.f32 %v3684_v63  ;;  %vm2337_vm3 = vmor %vm2335_vm2, %vm2336_vm15 }
 0x2da   : > { %v2332_v26 = vsub.f32 1.0, %v2331_v0  ;;  %vm2352_vm6 = vmor %vm2350_vm4, %vm2351_vm1 }
 0x2db   : > { %v3400_v51 = vmul.f32 -1.442695, %v2228_v61  ;;  %v3401_v3 = vmul.f32 -1.442695, %v2254_v62  ;;  %v2347_v37 = vsub.f32 1.0, %v2346_v4 }
 0x2dc   : > { %v2333_v2 = vmul.f32 %v3682_v60, %v2332_v26 }
 0x2dd   : > { %3685 = vpow2.f32 %v3400_v51  ;;  %v2348_v7 = vmul.f32 %v3684_v63, %v2347_v37 }
 0x2de   : > { %3687 = vpow2.f32 %v3401_v3  ;;  %v2216_v5 = vpop.f32.mrf.mxu3  ;;  %v2242_v33 = vpop.f32.mrf.mxu1  ;;  %v2334_v6 = vadd.f32 %v3682_v60, %v2333_v2 }
 0x2df   : > { %v2349_v10 = vadd.f32 %v3684_v63, %v2348_v7 }
 0x2e0   : > { %v2338_v11 = vsel %vm2337_vm3, %v3682_v60, %v2334_v6 }
 0x2e1   : > { %v2343_v14 = vsel %vm2340_vm5, %v2342_v9, %v2338_v11  ;;  %v2353_v15 = vsel %vm2352_vm6, %v3684_v63, %v2349_v10 }
 0x2e2   : > { %2393 = vst [vmem:[%s5277_s1 + $0x18] sm:$0xff] %v2343_v14  ;;  %v2358_v17 = vsel %vm2355_vm7, %v2357_v12, %v2353_v15 }
 0x2e3   : > { %v3686_v13 = vpop.eup %3685  ;;  %2394 = vst [vmem:[%s5277_s1 + $0x20] sm:$0xff] %v2358_v17 }
 0x2e4   : > { %v3688_v16 = vpop.eup %3687  ;;  %v2283_v18 = vadd.f32 1.0, %v3686_v13 }
 0x2e5   : > { %v2284_v19 = vadd.f32 1.0, %v3688_v16 }
 0x2e6   : > { %3689 = vrcp.f32 %v2283_v18  ;;  %v2371_v24 = vand.u32 2147483648, %v2283_v18  ;;  %v2369_v27 = vand.u32 2147483647, %v2283_v18  ;;  %vm2365_vm10 = vweird.f32 %v2283_v18 }
 0x2e7   : > { %3691 = vrcp.f32 %v2284_v19  ;;  %v2386_v28 = vand.u32 2147483648, %v2284_v19  ;;  %v2384_v31 = vand.u32 2147483647, %v2284_v19  ;;  %vm2380_vm12 = vweird.f32 %v2284_v19 }
 0x2e8   : > { %v2372_v34 = vor.u32 1.1754944e-38, %v2371_v24  ;;  %vm2370_vm13 = vcmp.eq.f32.partialorder %v2369_v27, 8.507059e+37 }
 0x2e9   : > { %v2387_v38 = vor.u32 1.1754944e-38, %v2386_v28  ;;  %vm2385_vm15 = vcmp.eq.f32.partialorder %v2384_v31, 8.507059e+37 }
 0x2ec   : > { %v3690_v20 = vpop.eup %3689 }
 0x2ed   : > { %v3692_v1 = vpop.eup %3691  ;;  %v2361_v21 = vmul.f32 %v3690_v20, %v2283_v18  ;;  %vm2366_vm8 = vweird.f32 %v3690_v20 }
 0x2ee   : > { %v2376_v22 = vmul.f32 %v3692_v1, %v2284_v19  ;;  %vm2381_vm9 = vweird.f32 %v3692_v1  ;;  %vm2367_vm11 = vmor %vm2365_vm10, %vm2366_vm8 }
 0x2ef   : > { %v2362_v23 = vsub.f32 1.0, %v2361_v21  ;;  %vm2382_vm14 = vmor %vm2380_vm12, %vm2381_vm9 }
 0x2f0   : > { %v2377_v25 = vsub.f32 1.0, %v2376_v22 }
 0x2f1   : > { %v2363_v49 = vmul.f32 %v3690_v20, %v2362_v23 }
 0x2f2   : > { %v2378_v29 = vmul.f32 %v3692_v1, %v2377_v25 }
 0x2f3   : > { %v2364_v32 = vadd.f32 %v3690_v20, %v2363_v49 }
 0x2f4   : > { %v2379_v35 = vadd.f32 %v3692_v1, %v2378_v29 }
 0x2f5   : > { %v2368_v36 = vsel %vm2367_vm11, %v3690_v20, %v2364_v32 }
 0x2f6   : > { %v2373_v39 = vsel %vm2370_vm13, %v2372_v34, %v2368_v36  ;;  %v2383_v40 = vsel %vm2382_vm14, %v3692_v1, %v2379_v35 }
 0x2f7   : > { %2395 = vst [vmem:[%s5277_s1 + $0x28] sm:$0xff] %v2373_v39  ;;  %v2388_v41 = vsel %vm2385_vm15, %v2387_v38, %v2383_v40 }
 0x2f8   : > { %2396 = vst.msk [vmem:[%s5277_s1 + $0x30] sm:$0xff] %vm1022_vm0, %v2388_v41 }
 0x2f9   : > { %3748 = shalt.err (!%p3745_p12)
}
 0x2fa   : > { %3620 = dma.vmem_to_hbm [thread:$0]  (%p3887_p5), %s2418_s21, 896, %s2420_s12, %s2399_s16  }
 0x2fb PF: > { %p3631_p13 = scmp.ge.s32.totalorder %s3787_s20, 2  ;;  %s2445_s29 = sand.u32 1, %s3775_s17  }
 0x2fc   : > { %s2446_s2 = scalar_lea.sflag [#allocation3], %s2445_s29 }
 0x2fd   : > { %p3625_p0 = pnand %p3631_p13, %p3891_p6 }
 0x2ff   : > { %p3626_p1 = pneg %p3625_p0 }
 0x301   : > { %3766 = dma.done.wait (%p3626_p1), %s2446_s2, 896  }
 0x302   : > { %3768 = vsyncadd (%p3626_p1), %s2446_s2, 4294966400  ;;  %s2456_s1 = scalar_lea.sflag [#allocation5], %s2445_s29 }
 0x303   : > { %3770 = dma.done.wait (%p3626_p1), %s2456_s1, 128  }
 0x304   : > { %3772 = vsyncadd (%p3626_p1), %s2456_s1, 4294967168  ;;  %s5350_s20 = sld [smem:[#allocation9_spill]]  ;;  %s5353_s17 = smov %s3779_s18 }
 0x305   : > { %s5351_s13 = sld [smem:[#allocation8_spill]] }
 0x306   : > { %s5352_s19 = sld [smem:[#allocation10_spill]] }
 0x30a   : > { %p25_p5 = scmp.ge.s32.totalorder %s5350_s20, 6  }
 0x30b   : > { %s5354_s18 = smov %s5351_s13 }
 0x30c   :  { %27 = sbr.rel (!%p25_p5) target bundleno = 9 (0x9), region = 115 }
 0x311   :  { %2462 = vsyncpa [#allocation3], 1 }
 0x312   :  { %2464 = vsyncpa [#allocation3 + $0x1], 1 }
 0x313   :  { %2465 = vsyncpa [#allocation5], 1 }
 0x314   :  { %2467 = vsyncpa [#allocation5 + $0x1], 1 }

</bundles_post_ra>
